<compile_context>
chip_gen: v7x
topology: tpu7x:2x2x1
jax: 0.10.0
libtpu: 0.0.40
codegen_flags: <defaults>
</compile_context>

<pallas_src>
import jax
import jax.numpy as jnp
from jax.experimental import pallas as pl
from jax.experimental.pallas import tpu as pltpu

# ---------------- model dimensions (small, consistent with the module) ------
N_BATCH = 2
C_IN = 4
H = W = 16
C_FEAT = 8
Z_DIM = 32
HW = H * W
N_FEATURES = C_FEAT * HW          # 2048
NHW = N_BATCH * HW                # 512  (lane dimension for conv GEMMs)


# ---------------- fused Pallas kernel ----------------------------------------
def _vae_fused_kernel(mask_ref, xt_ref, w_enc_ref, b_enc_ref, w_heads_ref,
                      b_heads_ref, u_ref, w_h_ref, b_h_ref, w_dec_ref, b_dec_ref,
                      o_xrec_ref, o_mulv_ref, h2_s, xf_s):
    f32 = jnp.float32
    bf16 = jnp.bfloat16

    mask = mask_ref[...]                      # [9, NHW] precomputed border masks

    def conv3x3(a, w_ref, b_ref):
        # a: [Cin, NHW] channel-major activations (f32), lane index p = n*HW + y*W + x.
        # w_ref: [9, Cout, Cin] tap-major conv weights; b_ref: [Cout, 1].
        # Nine accumulated per-tap GEMMs: per tap only one XLU roll + one VPU
        # mask multiply; no im2col concat tree, accumulator is a [Cout, NHW] value.
        acc = None
        for t in range(9):
            dy, dx = t // 3 - 1, t % 3 - 1
            off = dy * W + dx
            if off == 0:
                tap = a
            else:
                # tap[c, p] = a[c, p + off], zeroed at image borders / batch seams.
                tap = pltpu.roll(a, (-off) % NHW, 1) * mask[t:t + 1, :]
            part = jnp.dot(w_ref[t], tap, preferred_element_type=f32)
            acc = part if acc is None else acc + part
        return acc + b_ref[...]               # [Cout, NHW]  (lane-dense)

    # ---- encode: features_encoder = Conv2d(3x3, pad=1) + ReLU ---------------
    h_feat = jnp.maximum(conv3x3(xt_ref[...], w_enc_ref, b_enc_ref), 0.0)  # [C_FEAT, NHW]

    # torch.flatten(h, 1) on NCHW: h2[n, c*HW + s] = h_feat[c, n*HW + s].
    # Staged through a VMEM scratch with static-offset chunk stores.
    for n in range(N_BATCH):
        for c in range(C_FEAT):
            h2_s[n:n + 1, c * HW:(c + 1) * HW] = h_feat[c:c + 1, n * HW:(n + 1) * HW]

    # Fused expectation / log-variance heads: one bf16 GEMM (f32 accumulate),
    # one concatenated [N, 2*Z_DIM] output store.
    mu_lv = (jnp.dot(h2_s[...].astype(bf16), w_heads_ref[...],
                     preferred_element_type=f32) + b_heads_ref[...])
    o_mulv_ref[...] = mu_lv

    mu = mu_lv[:, :Z_DIM]
    lv = mu_lv[:, Z_DIM:]
    z = mu + u_ref[...] * jnp.exp(lv * 0.5)   # reparameterization

    # ---- decode: h_transform -> view(-1, *features_shape) -> conv -> tanh ---
    hd = (jnp.dot(z.astype(bf16), w_h_ref[...], preferred_element_type=f32)
          + b_h_ref[...])                     # [N, N_FEATURES]
    for c in range(C_FEAT):
        for n in range(N_BATCH):
            xf_s[c:c + 1, n * HW:(n + 1) * HW] = hd[n:n + 1, c * HW:(c + 1) * HW]

    o_xrec_ref[...] = jnp.tanh(conv3x3(xf_s[...], w_dec_ref, b_dec_ref))  # [C_IN, NHW]


# ---------------- parameters --------------------------------------------------
def init_params(key):
    """Raw parameters in PyTorch layouts (Conv2d OIHW, Linear stored pre-transposed)."""
    ks = jax.random.split(key, 10)
    s = 0.05
    g = lambda k, shp: s * jax.random.normal(k, shp, jnp.float32)
    return {
        "enc_w": g(ks[0], (C_FEAT, C_IN, 3, 3)), "enc_b": g(ks[1], (C_FEAT,)),
        "wmu": g(ks[2], (N_FEATURES, Z_DIM)),    "bmu": g(ks[3], (Z_DIM,)),
        "wlv": g(ks[4], (N_FEATURES, Z_DIM)),    "blv": g(ks[5], (Z_DIM,)),
        "wh":  g(ks[6], (Z_DIM, N_FEATURES)),    "bh":  g(ks[7], (N_FEATURES,)),
        "dec_w": g(ks[8], (C_IN, C_FEAT, 3, 3)), "dec_b": g(ks[9], (C_IN,)),
    }


def prepare_params(raw):
    """One-time repack (hoisted out of the step): tap-major conv weights, fused
    bf16 mu/log-var head weight, bf16 decoder-linear weight, f32 biases, and the
    [9, NHW] border-mask tensor shared by both convs."""
    f32, bf16 = jnp.float32, jnp.bfloat16
    p = jnp.arange(NHW, dtype=jnp.int32)
    xc = p % W
    yc = (p // W) % H
    rows = []
    for t in range(9):
        dy, dx = t // 3 - 1, t % 3 - 1
        valid = (yc + dy >= 0) & (yc + dy < H) & (xc + dx >= 0) & (xc + dx < W)
        rows.append(valid.astype(f32))
    mask = jnp.stack(rows, axis=0)                                  # [9, NHW]
    return {
        "mask": mask,
        # conv weights as [tap=kh*3+kw, Cout, Cin]
        "w_enc": raw["enc_w"].transpose(2, 3, 0, 1).reshape(9, C_FEAT, C_IN).astype(f32),
        "b_enc": raw["enc_b"].reshape(C_FEAT, 1).astype(f32),
        # concatenated mu / log-variance heads (bf16 weights, f32 bias)
        "w_heads": jnp.concatenate([raw["wmu"], raw["wlv"]], axis=1).astype(bf16),
        "b_heads": jnp.concatenate([raw["bmu"], raw["blv"]]).reshape(1, 2 * Z_DIM).astype(f32),
        "w_h": raw["wh"].astype(bf16),
        "b_h": raw["bh"].reshape(1, N_FEATURES).astype(f32),
        "w_dec": raw["dec_w"].transpose(2, 3, 0, 1).reshape(9, C_IN, C_FEAT).astype(f32),
        "b_dec": raw["dec_b"].reshape(C_IN, 1).astype(f32),
    }


# ---------------- forward ------------------------------------------------------
def vae_forward(kp, x, u):
    """x: [N, C_IN, H, W] NCHW; u: [N, Z_DIM] reparameterization noise."""
    n = x.shape[0]
    # Single layout transform at the API boundary: NCHW -> channel-major [C, N*H*W].
    xt = x.transpose(1, 0, 2, 3).reshape(C_IN, n * HW)
    vmem = pltpu.MemorySpace.VMEM
    xrec_cm, mu_lv = pl.pallas_call(
        _vae_fused_kernel,
        out_shape=(
            jax.ShapeDtypeStruct((C_IN, n * HW), jnp.float32),
            jax.ShapeDtypeStruct((n, 2 * Z_DIM), jnp.float32),
        ),
        in_specs=[pl.BlockSpec(memory_space=vmem)] * 11,
        out_specs=(
            pl.BlockSpec(memory_space=vmem),
            pl.BlockSpec(memory_space=vmem),
        ),
        scratch_shapes=[
            pltpu.VMEM((n, N_FEATURES), jnp.float32),   # flatten staging
            pltpu.VMEM((C_FEAT, n * HW), jnp.float32),  # un-flatten staging
        ],
    )(kp["mask"], xt, kp["w_enc"], kp["b_enc"], kp["w_heads"], kp["b_heads"],
      u, kp["w_h"], kp["b_h"], kp["w_dec"], kp["b_dec"])
    x_rec = xrec_cm.reshape(C_IN, n, H, W).transpose(1, 0, 2, 3)   # back to NCHW
    mu = mu_lv[:, :Z_DIM]
    log_sigma2 = mu_lv[:, Z_DIM:]
    return x_rec, mu, log_sigma2


# ---------------- pure-JAX reference (for numerical validation) ---------------
def vae_forward_ref(raw, x, u):
    dn = ("NCHW", "OIHW", "NCHW")
    h = jax.lax.conv_general_dilated(x, raw["enc_w"], (1, 1), ((1, 1), (1, 1)),
                                     dimension_numbers=dn)
    h = jnp.maximum(h + raw["enc_b"][None, :, None, None], 0.0)
    hf = h.reshape(x.shape[0], -1)
    mu = hf @ raw["wmu"] + raw["bmu"]
    lv = hf @ raw["wlv"] + raw["blv"]
    z = mu + u * jnp.exp(lv * 0.5)
    hd = z @ raw["wh"] + raw["bh"]
    xf = hd.reshape(x.shape[0], C_FEAT, H, W)
    xr = jax.lax.conv_general_dilated(xf, raw["dec_w"], (1, 1), ((1, 1), (1, 1)),
                                      dimension_numbers=dn)
    return jnp.tanh(xr + raw["dec_b"][None, :, None, None]), mu, lv


if __name__ == "__main__":
    root = jax.random.PRNGKey(0)
    k_param, k_x, k_noise = jax.random.split(root, 3)

    raw = init_params(k_param)
    kp = prepare_params(raw)   # one-time weight repack (hoisted out of the step)
    x = jax.random.normal(k_x, (N_BATCH, C_IN, H, W), dtype=jnp.float32)
    # TODO(synk): torch.randn uses PyTorch's RNG stream; we use jax.random with a
    # fixed key (same N(0,1) semantics, different stream), passed in explicitly.
    u = jax.random.normal(k_noise, (N_BATCH, Z_DIM), dtype=jnp.float32)

    fwd = jax.jit(vae_forward)
    x_rec, mu, log_sigma2 = fwd(kp, x, u)
    jax.block_until_ready((x_rec, mu, log_sigma2))

    # shape / sanity / numerical checks against the pure-XLA reference
    assert x_rec.shape == (N_BATCH, C_IN, H, W)
    assert mu.shape == (N_BATCH, Z_DIM)
    assert log_sigma2.shape == (N_BATCH, Z_DIM)
    assert bool(jnp.all(jnp.isfinite(x_rec)))

    xr_r, mu_r, lv_r = vae_forward_ref(raw, x, u)
    # Tolerance tightened vs. the previous 5e-2 while leaving headroom for the
    # bf16 head/decoder-linear weights (estimated error ~1e-3 .. 1e-2).
    for got, ref in ((x_rec, xr_r), (mu, mu_r), (log_sigma2, lv_r)):
        assert float(jnp.max(jnp.abs(got - ref))) < 4e-2

    print("KERNEL_OK")
</pallas_src>

<mosaic_0001>
module attributes {stable_mosaic.version = 11 : i64} {
  func.func @_vae_fused_kernel(%arg0: memref<9x512xf32, #tpu.memory_space<vmem>>, %arg1: memref<4x512xf32, #tpu.memory_space<vmem>>, %arg2: memref<9x8x4xf32, #tpu.memory_space<vmem>>, %arg3: memref<8x1xf32, #tpu.memory_space<vmem>>, %arg4: memref<2048x64xbf16, #tpu.memory_space<vmem>>, %arg5: memref<1x64xf32, #tpu.memory_space<vmem>>, %arg6: memref<2x32xf32, #tpu.memory_space<vmem>>, %arg7: memref<32x2048xbf16, #tpu.memory_space<vmem>>, %arg8: memref<1x2048xf32, #tpu.memory_space<vmem>>, %arg9: memref<9x4x8xf32, #tpu.memory_space<vmem>>, %arg10: memref<4x1xf32, #tpu.memory_space<vmem>>, %arg11: memref<4x512xf32, #tpu.memory_space<vmem>>, %arg12: memref<2x64xf32, #tpu.memory_space<vmem>>, %arg13: memref<2x2048xf32, #tpu.memory_space<vmem>>, %arg14: memref<8x512xf32, #tpu.memory_space<vmem>>) attributes {dimension_semantics = [], scalar_prefetch = 0 : i64, scratch_operands = 2 : i64, tpu.core_type = #tpu.core_type<tc>} {
    %c0 = arith.constant 0 : index
    %c0_0 = arith.constant 0 : index
    %0 = vector.load %arg0[%c0, %c0_0] : memref<9x512xf32, #tpu.memory_space<vmem>>, vector<9x512xf32>
    %c0_1 = arith.constant 0 : index
    %c0_2 = arith.constant 0 : index
    %1 = vector.load %arg1[%c0_1, %c0_2] : memref<4x512xf32, #tpu.memory_space<vmem>>, vector<4x512xf32>
    %c17_i32 = arith.constant 17 : i32
    %2 = tpu.dynamic_rotate %1 by %c17_i32 dim 1 : vector<4x512xf32>, i32 -> vector<4x512xf32>
    %3 = vector.extract_strided_slice %0 {offsets = [0, 0], sizes = [1, 512], strides = [1, 1]} : vector<9x512xf32> to vector<1x512xf32>
    %4 = vector.broadcast %3 : vector<1x512xf32> to vector<4x512xf32>
    %5 = arith.mulf %2, %4 : vector<4x512xf32>
    %c0_3 = arith.constant 0 : index
    %c0_4 = arith.constant 0 : index
    %c0_5 = arith.constant 0 : index
    %6 = vector.load %arg2[%c0_3, %c0_4, %c0_5] : memref<9x8x4xf32, #tpu.memory_space<vmem>>, vector<1x8x4xf32>
    %7 = vector.shape_cast %6 : vector<1x8x4xf32> to vector<8x4xf32>
    %cst = arith.constant dense<0.000000e+00> : vector<8x512xf32>
    %8 = tpu.matmul %7, %5, %cst {dimension_numbers = #tpu.dot_dimension_numbers<[1], [0], [0], [1], [0, 0, 1, 1], [], []>} : vector<8x4xf32>, vector<4x512xf32>, vector<8x512xf32> -> vector<8x512xf32>
    %c16_i32 = arith.constant 16 : i32
    %9 = tpu.dynamic_rotate %1 by %c16_i32 dim 1 : vector<4x512xf32>, i32 -> vector<4x512xf32>
    %10 = vector.extract_strided_slice %0 {offsets = [1, 0], sizes = [1, 512], strides = [1, 1]} : vector<9x512xf32> to vector<1x512xf32>
    %11 = vector.broadcast %10 : vector<1x512xf32> to vector<4x512xf32>
    %12 = arith.mulf %9, %11 : vector<4x512xf32>
    %c1 = arith.constant 1 : index
    %c0_6 = arith.constant 0 : index
    %c0_7 = arith.constant 0 : index
    %13 = vector.load %arg2[%c1, %c0_6, %c0_7] : memref<9x8x4xf32, #tpu.memory_space<vmem>>, vector<1x8x4xf32>
    %14 = vector.shape_cast %13 : vector<1x8x4xf32> to vector<8x4xf32>
    %cst_8 = arith.constant dense<0.000000e+00> : vector<8x512xf32>
    %15 = tpu.matmul %14, %12, %cst_8 {dimension_numbers = #tpu.dot_dimension_numbers<[1], [0], [0], [1], [0, 0, 1, 1], [], []>} : vector<8x4xf32>, vector<4x512xf32>, vector<8x512xf32> -> vector<8x512xf32>
    %16 = arith.addf %8, %15 : vector<8x512xf32>
    %c15_i32 = arith.constant 15 : i32
    %17 = tpu.dynamic_rotate %1 by %c15_i32 dim 1 : vector<4x512xf32>, i32 -> vector<4x512xf32>
    %18 = vector.extract_strided_slice %0 {offsets = [2, 0], sizes = [1, 512], strides = [1, 1]} : vector<9x512xf32> to vector<1x512xf32>
    %19 = vector.broadcast %18 : vector<1x512xf32> to vector<4x512xf32>
    %20 = arith.mulf %17, %19 : vector<4x512xf32>
    %c2 = arith.constant 2 : index
    %c0_9 = arith.constant 0 : index
    %c0_10 = arith.constant 0 : index
    %21 = vector.load %arg2[%c2, %c0_9, %c0_10] : memref<9x8x4xf32, #tpu.memory_space<vmem>>, vector<1x8x4xf32>
    %22 = vector.shape_cast %21 : vector<1x8x4xf32> to vector<8x4xf32>
    %cst_11 = arith.constant dense<0.000000e+00> : vector<8x512xf32>
    %23 = tpu.matmul %22, %20, %cst_11 {dimension_numbers = #tpu.dot_dimension_numbers<[1], [0], [0], [1], [0, 0, 1, 1], [], []>} : vector<8x4xf32>, vector<4x512xf32>, vector<8x512xf32> -> vector<8x512xf32>
    %24 = arith.addf %16, %23 : vector<8x512xf32>
    %c1_i32 = arith.constant 1 : i32
    %25 = tpu.dynamic_rotate %1 by %c1_i32 dim 1 : vector<4x512xf32>, i32 -> vector<4x512xf32>
    %26 = vector.extract_strided_slice %0 {offsets = [3, 0], sizes = [1, 512], strides = [1, 1]} : vector<9x512xf32> to vector<1x512xf32>
    %27 = vector.broadcast %26 : vector<1x512xf32> to vector<4x512xf32>
    %28 = arith.mulf %25, %27 : vector<4x512xf32>
    %c3 = arith.constant 3 : index
    %c0_12 = arith.constant 0 : index
    %c0_13 = arith.constant 0 : index
    %29 = vector.load %arg2[%c3, %c0_12, %c0_13] : memref<9x8x4xf32, #tpu.memory_space<vmem>>, vector<1x8x4xf32>
    %30 = vector.shape_cast %29 : vector<1x8x4xf32> to vector<8x4xf32>
    %cst_14 = arith.constant dense<0.000000e+00> : vector<8x512xf32>
    %31 = tpu.matmul %30, %28, %cst_14 {dimension_numbers = #tpu.dot_dimension_numbers<[1], [0], [0], [1], [0, 0, 1, 1], [], []>} : vector<8x4xf32>, vector<4x512xf32>, vector<8x512xf32> -> vector<8x512xf32>
    %32 = arith.addf %24, %31 : vector<8x512xf32>
    %c4 = arith.constant 4 : index
    %c0_15 = arith.constant 0 : index
    %c0_16 = arith.constant 0 : index
    %33 = vector.load %arg2[%c4, %c0_15, %c0_16] : memref<9x8x4xf32, #tpu.memory_space<vmem>>, vector<1x8x4xf32>
    %34 = vector.shape_cast %33 : vector<1x8x4xf32> to vector<8x4xf32>
    %cst_17 = arith.constant dense<0.000000e+00> : vector<8x512xf32>
    %35 = tpu.matmul %34, %1, %cst_17 {dimension_numbers = #tpu.dot_dimension_numbers<[1], [0], [0], [1], [0, 0, 1, 1], [], []>} : vector<8x4xf32>, vector<4x512xf32>, vector<8x512xf32> -> vector<8x512xf32>
    %36 = arith.addf %32, %35 : vector<8x512xf32>
    %c511_i32 = arith.constant 511 : i32
    %37 = tpu.dynamic_rotate %1 by %c511_i32 dim 1 : vector<4x512xf32>, i32 -> vector<4x512xf32>
    %38 = vector.extract_strided_slice %0 {offsets = [5, 0], sizes = [1, 512], strides = [1, 1]} : vector<9x512xf32> to vector<1x512xf32>
    %39 = vector.broadcast %38 : vector<1x512xf32> to vector<4x512xf32>
    %40 = arith.mulf %37, %39 : vector<4x512xf32>
    %c5 = arith.constant 5 : index
    %c0_18 = arith.constant 0 : index
    %c0_19 = arith.constant 0 : index
    %41 = vector.load %arg2[%c5, %c0_18, %c0_19] : memref<9x8x4xf32, #tpu.memory_space<vmem>>, vector<1x8x4xf32>
    %42 = vector.shape_cast %41 : vector<1x8x4xf32> to vector<8x4xf32>
    %cst_20 = arith.constant dense<0.000000e+00> : vector<8x512xf32>
    %43 = tpu.matmul %42, %40, %cst_20 {dimension_numbers = #tpu.dot_dimension_numbers<[1], [0], [0], [1], [0, 0, 1, 1], [], []>} : vector<8x4xf32>, vector<4x512xf32>, vector<8x512xf32> -> vector<8x512xf32>
    %44 = arith.addf %36, %43 : vector<8x512xf32>
    %c497_i32 = arith.constant 497 : i32
    %45 = tpu.dynamic_rotate %1 by %c497_i32 dim 1 : vector<4x512xf32>, i32 -> vector<4x512xf32>
    %46 = vector.extract_strided_slice %0 {offsets = [6, 0], sizes = [1, 512], strides = [1, 1]} : vector<9x512xf32> to vector<1x512xf32>
    %47 = vector.broadcast %46 : vector<1x512xf32> to vector<4x512xf32>
    %48 = arith.mulf %45, %47 : vector<4x512xf32>
    %c6 = arith.constant 6 : index
    %c0_21 = arith.constant 0 : index
    %c0_22 = arith.constant 0 : index
    %49 = vector.load %arg2[%c6, %c0_21, %c0_22] : memref<9x8x4xf32, #tpu.memory_space<vmem>>, vector<1x8x4xf32>
    %50 = vector.shape_cast %49 : vector<1x8x4xf32> to vector<8x4xf32>
    %cst_23 = arith.constant dense<0.000000e+00> : vector<8x512xf32>
    %51 = tpu.matmul %50, %48, %cst_23 {dimension_numbers = #tpu.dot_dimension_numbers<[1], [0], [0], [1], [0, 0, 1, 1], [], []>} : vector<8x4xf32>, vector<4x512xf32>, vector<8x512xf32> -> vector<8x512xf32>
    %52 = arith.addf %44, %51 : vector<8x512xf32>
    %c496_i32 = arith.constant 496 : i32
    %53 = tpu.dynamic_rotate %1 by %c496_i32 dim 1 : vector<4x512xf32>, i32 -> vector<4x512xf32>
    %54 = vector.extract_strided_slice %0 {offsets = [7, 0], sizes = [1, 512], strides = [1, 1]} : vector<9x512xf32> to vector<1x512xf32>
    %55 = vector.broadcast %54 : vector<1x512xf32> to vector<4x512xf32>
    %56 = arith.mulf %53, %55 : vector<4x512xf32>
    %c7 = arith.constant 7 : index
    %c0_24 = arith.constant 0 : index
    %c0_25 = arith.constant 0 : index
    %57 = vector.load %arg2[%c7, %c0_24, %c0_25] : memref<9x8x4xf32, #tpu.memory_space<vmem>>, vector<1x8x4xf32>
    %58 = vector.shape_cast %57 : vector<1x8x4xf32> to vector<8x4xf32>
    %cst_26 = arith.constant dense<0.000000e+00> : vector<8x512xf32>
    %59 = tpu.matmul %58, %56, %cst_26 {dimension_numbers = #tpu.dot_dimension_numbers<[1], [0], [0], [1], [0, 0, 1, 1], [], []>} : vector<8x4xf32>, vector<4x512xf32>, vector<8x512xf32> -> vector<8x512xf32>
    %60 = arith.addf %52, %59 : vector<8x512xf32>
    %c495_i32 = arith.constant 495 : i32
    %61 = tpu.dynamic_rotate %1 by %c495_i32 dim 1 : vector<4x512xf32>, i32 -> vector<4x512xf32>
    %62 = vector.extract_strided_slice %0 {offsets = [8, 0], sizes = [1, 512], strides = [1, 1]} : vector<9x512xf32> to vector<1x512xf32>
    %63 = vector.broadcast %62 : vector<1x512xf32> to vector<4x512xf32>
    %64 = arith.mulf %61, %63 : vector<4x512xf32>
    %c8 = arith.constant 8 : index
    %c0_27 = arith.constant 0 : index
    %c0_28 = arith.constant 0 : index
    %65 = vector.load %arg2[%c8, %c0_27, %c0_28] : memref<9x8x4xf32, #tpu.memory_space<vmem>>, vector<1x8x4xf32>
    %66 = vector.shape_cast %65 : vector<1x8x4xf32> to vector<8x4xf32>
    %cst_29 = arith.constant dense<0.000000e+00> : vector<8x512xf32>
    %67 = tpu.matmul %66, %64, %cst_29 {dimension_numbers = #tpu.dot_dimension_numbers<[1], [0], [0], [1], [0, 0, 1, 1], [], []>} : vector<8x4xf32>, vector<4x512xf32>, vector<8x512xf32> -> vector<8x512xf32>
    %68 = arith.addf %60, %67 : vector<8x512xf32>
    %c0_30 = arith.constant 0 : index
    %c0_31 = arith.constant 0 : index
    %69 = vector.load %arg3[%c0_30, %c0_31] : memref<8x1xf32, #tpu.memory_space<vmem>>, vector<8x1xf32>
    %70 = vector.broadcast %69 : vector<8x1xf32> to vector<8x512xf32>
    %71 = arith.addf %68, %70 : vector<8x512xf32>
    %cst_32 = arith.constant 0.000000e+00 : f32
    %72 = vector.broadcast %cst_32 : f32 to vector<8x512xf32>
    %73 = arith.maximumf %71, %72 : vector<8x512xf32>
    %74 = vector.extract_strided_slice %73 {offsets = [0, 0], sizes = [1, 256], strides = [1, 1]} : vector<8x512xf32> to vector<1x256xf32>
    %c0_33 = arith.constant 0 : index
    %c0_34 = arith.constant 0 : index
    %75 = vector.load %arg13[%c0_33, %c0_34] : memref<2x2048xf32, #tpu.memory_space<vmem>>, vector<1x256xf32>
    tpu.vector_store %arg13[%c0_33, %c0_34], %74 {strides = array<i32>} : memref<2x2048xf32, #tpu.memory_space<vmem>>, vector<1x256xf32>,
    %76 = vector.extract_strided_slice %73 {offsets = [1, 0], sizes = [1, 256], strides = [1, 1]} : vector<8x512xf32> to vector<1x256xf32>
    %c0_35 = arith.constant 0 : index
    %c256 = arith.constant 256 : index
    %77 = vector.load %arg13[%c0_35, %c256] : memref<2x2048xf32, #tpu.memory_space<vmem>>, vector<1x256xf32>
    tpu.vector_store %arg13[%c0_35, %c256], %76 {strides = array<i32>} : memref<2x2048xf32, #tpu.memory_space<vmem>>, vector<1x256xf32>,
    %78 = vector.extract_strided_slice %73 {offsets = [2, 0], sizes = [1, 256], strides = [1, 1]} : vector<8x512xf32> to vector<1x256xf32>
    %c0_36 = arith.constant 0 : index
    %c512 = arith.constant 512 : index
    %79 = vector.load %arg13[%c0_36, %c512] : memref<2x2048xf32, #tpu.memory_space<vmem>>, vector<1x256xf32>
    tpu.vector_store %arg13[%c0_36, %c512], %78 {strides = array<i32>} : memref<2x2048xf32, #tpu.memory_space<vmem>>, vector<1x256xf32>,
    %80 = vector.extract_strided_slice %73 {offsets = [3, 0], sizes = [1, 256], strides = [1, 1]} : vector<8x512xf32> to vector<1x256xf32>
    %c0_37 = arith.constant 0 : index
    %c768 = arith.constant 768 : index
    %81 = vector.load %arg13[%c0_37, %c768] : memref<2x2048xf32, #tpu.memory_space<vmem>>, vector<1x256xf32>
    tpu.vector_store %arg13[%c0_37, %c768], %80 {strides = array<i32>} : memref<2x2048xf32, #tpu.memory_space<vmem>>, vector<1x256xf32>,
    %82 = vector.extract_strided_slice %73 {offsets = [4, 0], sizes = [1, 256], strides = [1, 1]} : vector<8x512xf32> to vector<1x256xf32>
    %c0_38 = arith.constant 0 : index
    %c1024 = arith.constant 1024 : index
    %83 = vector.load %arg13[%c0_38, %c1024] : memref<2x2048xf32, #tpu.memory_space<vmem>>, vector<1x256xf32>
    tpu.vector_store %arg13[%c0_38, %c1024], %82 {strides = array<i32>} : memref<2x2048xf32, #tpu.memory_space<vmem>>, vector<1x256xf32>,
    %84 = vector.extract_strided_slice %73 {offsets = [5, 0], sizes = [1, 256], strides = [1, 1]} : vector<8x512xf32> to vector<1x256xf32>
    %c0_39 = arith.constant 0 : index
    %c1280 = arith.constant 1280 : index
    %85 = vector.load %arg13[%c0_39, %c1280] : memref<2x2048xf32, #tpu.memory_space<vmem>>, vector<1x256xf32>
    tpu.vector_store %arg13[%c0_39, %c1280], %84 {strides = array<i32>} : memref<2x2048xf32, #tpu.memory_space<vmem>>, vector<1x256xf32>,
    %86 = vector.extract_strided_slice %73 {offsets = [6, 0], sizes = [1, 256], strides = [1, 1]} : vector<8x512xf32> to vector<1x256xf32>
    %c0_40 = arith.constant 0 : index
    %c1536 = arith.constant 1536 : index
    %87 = vector.load %arg13[%c0_40, %c1536] : memref<2x2048xf32, #tpu.memory_space<vmem>>, vector<1x256xf32>
    tpu.vector_store %arg13[%c0_40, %c1536], %86 {strides = array<i32>} : memref<2x2048xf32, #tpu.memory_space<vmem>>, vector<1x256xf32>,
    %88 = vector.extract_strided_slice %73 {offsets = [7, 0], sizes = [1, 256], strides = [1, 1]} : vector<8x512xf32> to vector<1x256xf32>
    %c0_41 = arith.constant 0 : index
    %c1792 = arith.constant 1792 : index
    %89 = vector.load %arg13[%c0_41, %c1792] : memref<2x2048xf32, #tpu.memory_space<vmem>>, vector<1x256xf32>
    tpu.vector_store %arg13[%c0_41, %c1792], %88 {strides = array<i32>} : memref<2x2048xf32, #tpu.memory_space<vmem>>, vector<1x256xf32>,
    %90 = vector.extract_strided_slice %73 {offsets = [0, 256], sizes = [1, 256], strides = [1, 1]} : vector<8x512xf32> to vector<1x256xf32>
    %c1_42 = arith.constant 1 : index
    %c0_43 = arith.constant 0 : index
    %91 = vector.load %arg13[%c1_42, %c0_43] : memref<2x2048xf32, #tpu.memory_space<vmem>>, vector<1x256xf32>
    tpu.vector_store %arg13[%c1_42, %c0_43], %90 {strides = array<i32>} : memref<2x2048xf32, #tpu.memory_space<vmem>>, vector<1x256xf32>,
    %92 = vector.extract_strided_slice %73 {offsets = [1, 256], sizes = [1, 256], strides = [1, 1]} : vector<8x512xf32> to vector<1x256xf32>
    %c1_44 = arith.constant 1 : index
    %c256_45 = arith.constant 256 : index
    %93 = vector.load %arg13[%c1_44, %c256_45] : memref<2x2048xf32, #tpu.memory_space<vmem>>, vector<1x256xf32>
    tpu.vector_store %arg13[%c1_44, %c256_45], %92 {strides = array<i32>} : memref<2x2048xf32, #tpu.memory_space<vmem>>, vector<1x256xf32>,
    %94 = vector.extract_strided_slice %73 {offsets = [2, 256], sizes = [1, 256], strides = [1, 1]} : vector<8x512xf32> to vector<1x256xf32>
    %c1_46 = arith.constant 1 : index
    %c512_47 = arith.constant 512 : index
    %95 = vector.load %arg13[%c1_46, %c512_47] : memref<2x2048xf32, #tpu.memory_space<vmem>>, vector<1x256xf32>
    tpu.vector_store %arg13[%c1_46, %c512_47], %94 {strides = array<i32>} : memref<2x2048xf32, #tpu.memory_space<vmem>>, vector<1x256xf32>,
    %96 = vector.extract_strided_slice %73 {offsets = [3, 256], sizes = [1, 256], strides = [1, 1]} : vector<8x512xf32> to vector<1x256xf32>
    %c1_48 = arith.constant 1 : index
    %c768_49 = arith.constant 768 : index
    %97 = vector.load %arg13[%c1_48, %c768_49] : memref<2x2048xf32, #tpu.memory_space<vmem>>, vector<1x256xf32>
    tpu.vector_store %arg13[%c1_48, %c768_49], %96 {strides = array<i32>} : memref<2x2048xf32, #tpu.memory_space<vmem>>, vector<1x256xf32>,
    %98 = vector.extract_strided_slice %73 {offsets = [4, 256], sizes = [1, 256], strides = [1, 1]} : vector<8x512xf32> to vector<1x256xf32>
    %c1_50 = arith.constant 1 : index
    %c1024_51 = arith.constant 1024 : index
    %99 = vector.load %arg13[%c1_50, %c1024_51] : memref<2x2048xf32, #tpu.memory_space<vmem>>, vector<1x256xf32>
    tpu.vector_store %arg13[%c1_50, %c1024_51], %98 {strides = array<i32>} : memref<2x2048xf32, #tpu.memory_space<vmem>>, vector<1x256xf32>,
    %100 = vector.extract_strided_slice %73 {offsets = [5, 256], sizes = [1, 256], strides = [1, 1]} : vector<8x512xf32> to vector<1x256xf32>
    %c1_52 = arith.constant 1 : index
    %c1280_53 = arith.constant 1280 : index
    %101 = vector.load %arg13[%c1_52, %c1280_53] : memref<2x2048xf32, #tpu.memory_space<vmem>>, vector<1x256xf32>
    tpu.vector_store %arg13[%c1_52, %c1280_53], %100 {strides = array<i32>} : memref<2x2048xf32, #tpu.memory_space<vmem>>, vector<1x256xf32>,
    %102 = vector.extract_strided_slice %73 {offsets = [6, 256], sizes = [1, 256], strides = [1, 1]} : vector<8x512xf32> to vector<1x256xf32>
    %c1_54 = arith.constant 1 : index
    %c1536_55 = arith.constant 1536 : index
    %103 = vector.load %arg13[%c1_54, %c1536_55] : memref<2x2048xf32, #tpu.memory_space<vmem>>, vector<1x256xf32>
    tpu.vector_store %arg13[%c1_54, %c1536_55], %102 {strides = array<i32>} : memref<2x2048xf32, #tpu.memory_space<vmem>>, vector<1x256xf32>,
    %104 = vector.extract_strided_slice %73 {offsets = [7, 256], sizes = [1, 256], strides = [1, 1]} : vector<8x512xf32> to vector<1x256xf32>
    %c1_56 = arith.constant 1 : index
    %c1792_57 = arith.constant 1792 : index
    %105 = vector.load %arg13[%c1_56, %c1792_57] : memref<2x2048xf32, #tpu.memory_space<vmem>>, vector<1x256xf32>
    tpu.vector_store %arg13[%c1_56, %c1792_57], %104 {strides = array<i32>} : memref<2x2048xf32, #tpu.memory_space<vmem>>, vector<1x256xf32>,
    %c0_58 = arith.constant 0 : index
    %c0_59 = arith.constant 0 : index
    %106 = vector.load %arg13[%c0_58, %c0_59] : memref<2x2048xf32, #tpu.memory_space<vmem>>, vector<2x2048xf32>
    %107 = arith.truncf %106 : vector<2x2048xf32> to vector<2x2048xbf16>
    %c0_60 = arith.constant 0 : index
    %c0_61 = arith.constant 0 : index
    %108 = vector.load %arg4[%c0_60, %c0_61] : memref<2048x64xbf16, #tpu.memory_space<vmem>>, vector<2048x64xbf16>
    %cst_62 = arith.constant dense<0.000000e+00> : vector<2x64xf32>
    %109 = tpu.matmul %107, %108, %cst_62 {dimension_numbers = #tpu.dot_dimension_numbers<[1], [0], [0], [1], [0, 0, 1, 1], [], []>} : vector<2x2048xbf16>, vector<2048x64xbf16>, vector<2x64xf32> -> vector<2x64xf32>
    %c0_63 = arith.constant 0 : index
    %c0_64 = arith.constant 0 : index
    %110 = vector.load %arg5[%c0_63, %c0_64] : memref<1x64xf32, #tpu.memory_space<vmem>>, vector<1x64xf32>
    %111 = vector.broadcast %110 : vector<1x64xf32> to vector<2x64xf32>
    %112 = arith.addf %109, %111 : vector<2x64xf32>
    %c0_65 = arith.constant 0 : index
    %c0_66 = arith.constant 0 : index
    %113 = vector.load %arg12[%c0_65, %c0_66] : memref<2x64xf32, #tpu.memory_space<vmem>>, vector<2x64xf32>
    tpu.vector_store %arg12[%c0_65, %c0_66], %112 {strides = array<i32>} : memref<2x64xf32, #tpu.memory_space<vmem>>, vector<2x64xf32>,
    %114 = vector.extract_strided_slice %112 {offsets = [0, 0], sizes = [2, 32], strides = [1, 1]} : vector<2x64xf32> to vector<2x32xf32>
    %115 = vector.extract_strided_slice %112 {offsets = [0, 32], sizes = [2, 32], strides = [1, 1]} : vector<2x64xf32> to vector<2x32xf32>
    %c0_67 = arith.constant 0 : index
    %c0_68 = arith.constant 0 : index
    %116 = vector.load %arg6[%c0_67, %c0_68] : memref<2x32xf32, #tpu.memory_space<vmem>>, vector<2x32xf32>
    %cst_69 = arith.constant 5.000000e-01 : f32
    %117 = vector.broadcast %cst_69 : f32 to vector<2x32xf32>
    %118 = arith.mulf %115, %117 : vector<2x32xf32>
    %119 = math.exp %118 : vector<2x32xf32>
    %120 = arith.mulf %116, %119 : vector<2x32xf32>
    %121 = arith.addf %114, %120 : vector<2x32xf32>
    %122 = arith.truncf %121 : vector<2x32xf32> to vector<2x32xbf16>
    %c0_70 = arith.constant 0 : index
    %c0_71 = arith.constant 0 : index
    %123 = vector.load %arg7[%c0_70, %c0_71] : memref<32x2048xbf16, #tpu.memory_space<vmem>>, vector<32x2048xbf16>
    %cst_72 = arith.constant dense<0.000000e+00> : vector<2x2048xf32>
    %124 = tpu.matmul %122, %123, %cst_72 {dimension_numbers = #tpu.dot_dimension_numbers<[1], [0], [0], [1], [0, 0, 1, 1], [], []>} : vector<2x32xbf16>, vector<32x2048xbf16>, vector<2x2048xf32> -> vector<2x2048xf32>
    %c0_73 = arith.constant 0 : index
    %c0_74 = arith.constant 0 : index
    %125 = vector.load %arg8[%c0_73, %c0_74] : memref<1x2048xf32, #tpu.memory_space<vmem>>, vector<1x2048xf32>
    %126 = vector.broadcast %125 : vector<1x2048xf32> to vector<2x2048xf32>
    %127 = arith.addf %124, %126 : vector<2x2048xf32>
    %128 = vector.extract_strided_slice %127 {offsets = [0, 0], sizes = [1, 256], strides = [1, 1]} : vector<2x2048xf32> to vector<1x256xf32>
    %c0_75 = arith.constant 0 : index
    %c0_76 = arith.constant 0 : index
    %129 = vector.load %arg14[%c0_75, %c0_76] : memref<8x512xf32, #tpu.memory_space<vmem>>, vector<1x256xf32>
    tpu.vector_store %arg14[%c0_75, %c0_76], %128 {strides = array<i32>} : memref<8x512xf32, #tpu.memory_space<vmem>>, vector<1x256xf32>,
    %130 = vector.extract_strided_slice %127 {offsets = [1, 0], sizes = [1, 256], strides = [1, 1]} : vector<2x2048xf32> to vector<1x256xf32>
    %c0_77 = arith.constant 0 : index
    %c256_78 = arith.constant 256 : index
    %131 = vector.load %arg14[%c0_77, %c256_78] : memref<8x512xf32, #tpu.memory_space<vmem>>, vector<1x256xf32>
    tpu.vector_store %arg14[%c0_77, %c256_78], %130 {strides = array<i32>} : memref<8x512xf32, #tpu.memory_space<vmem>>, vector<1x256xf32>,
    %132 = vector.extract_strided_slice %127 {offsets = [0, 256], sizes = [1, 256], strides = [1, 1]} : vector<2x2048xf32> to vector<1x256xf32>
    %c1_79 = arith.constant 1 : index
    %c0_80 = arith.constant 0 : index
    %133 = vector.load %arg14[%c1_79, %c0_80] : memref<8x512xf32, #tpu.memory_space<vmem>>, vector<1x256xf32>
    tpu.vector_store %arg14[%c1_79, %c0_80], %132 {strides = array<i32>} : memref<8x512xf32, #tpu.memory_space<vmem>>, vector<1x256xf32>,
    %134 = vector.extract_strided_slice %127 {offsets = [1, 256], sizes = [1, 256], strides = [1, 1]} : vector<2x2048xf32> to vector<1x256xf32>
    %c1_81 = arith.constant 1 : index
    %c256_82 = arith.constant 256 : index
    %135 = vector.load %arg14[%c1_81, %c256_82] : memref<8x512xf32, #tpu.memory_space<vmem>>, vector<1x256xf32>
    tpu.vector_store %arg14[%c1_81, %c256_82], %134 {strides = array<i32>} : memref<8x512xf32, #tpu.memory_space<vmem>>, vector<1x256xf32>,
    %136 = vector.extract_strided_slice %127 {offsets = [0, 512], sizes = [1, 256], strides = [1, 1]} : vector<2x2048xf32> to vector<1x256xf32>
    %c2_83 = arith.constant 2 : index
    %c0_84 = arith.constant 0 : index
    %137 = vector.load %arg14[%c2_83, %c0_84] : memref<8x512xf32, #tpu.memory_space<vmem>>, vector<1x256xf32>
    tpu.vector_store %arg14[%c2_83, %c0_84], %136 {strides = array<i32>} : memref<8x512xf32, #tpu.memory_space<vmem>>, vector<1x256xf32>,
    %138 = vector.extract_strided_slice %127 {offsets = [1, 512], sizes = [1, 256], strides = [1, 1]} : vector<2x2048xf32> to vector<1x256xf32>
    %c2_85 = arith.constant 2 : index
    %c256_86 = arith.constant 256 : index
    %139 = vector.load %arg14[%c2_85, %c256_86] : memref<8x512xf32, #tpu.memory_space<vmem>>, vector<1x256xf32>
    tpu.vector_store %arg14[%c2_85, %c256_86], %138 {strides = array<i32>} : memref<8x512xf32, #tpu.memory_space<vmem>>, vector<1x256xf32>,
    %140 = vector.extract_strided_slice %127 {offsets = [0, 768], sizes = [1, 256], strides = [1, 1]} : vector<2x2048xf32> to vector<1x256xf32>
    %c3_87 = arith.constant 3 : index
    %c0_88 = arith.constant 0 : index
    %141 = vector.load %arg14[%c3_87, %c0_88] : memref<8x512xf32, #tpu.memory_space<vmem>>, vector<1x256xf32>
    tpu.vector_store %arg14[%c3_87, %c0_88], %140 {strides = array<i32>} : memref<8x512xf32, #tpu.memory_space<vmem>>, vector<1x256xf32>,
    %142 = vector.extract_strided_slice %127 {offsets = [1, 768], sizes = [1, 256], strides = [1, 1]} : vector<2x2048xf32> to vector<1x256xf32>
    %c3_89 = arith.constant 3 : index
    %c256_90 = arith.constant 256 : index
    %143 = vector.load %arg14[%c3_89, %c256_90] : memref<8x512xf32, #tpu.memory_space<vmem>>, vector<1x256xf32>
    tpu.vector_store %arg14[%c3_89, %c256_90], %142 {strides = array<i32>} : memref<8x512xf32, #tpu.memory_space<vmem>>, vector<1x256xf32>,
    %144 = vector.extract_strided_slice %127 {offsets = [0, 1024], sizes = [1, 256], strides = [1, 1]} : vector<2x2048xf32> to vector<1x256xf32>
    %c4_91 = arith.constant 4 : index
    %c0_92 = arith.constant 0 : index
    %145 = vector.load %arg14[%c4_91, %c0_92] : memref<8x512xf32, #tpu.memory_space<vmem>>, vector<1x256xf32>
    tpu.vector_store %arg14[%c4_91, %c0_92], %144 {strides = array<i32>} : memref<8x512xf32, #tpu.memory_space<vmem>>, vector<1x256xf32>,
    %146 = vector.extract_strided_slice %127 {offsets = [1, 1024], sizes = [1, 256], strides = [1, 1]} : vector<2x2048xf32> to vector<1x256xf32>
    %c4_93 = arith.constant 4 : index
    %c256_94 = arith.constant 256 : index
    %147 = vector.load %arg14[%c4_93, %c256_94] : memref<8x512xf32, #tpu.memory_space<vmem>>, vector<1x256xf32>
    tpu.vector_store %arg14[%c4_93, %c256_94], %146 {strides = array<i32>} : memref<8x512xf32, #tpu.memory_space<vmem>>, vector<1x256xf32>,
    %148 = vector.extract_strided_slice %127 {offsets = [0, 1280], sizes = [1, 256], strides = [1, 1]} : vector<2x2048xf32> to vector<1x256xf32>
    %c5_95 = arith.constant 5 : index
    %c0_96 = arith.constant 0 : index
    %149 = vector.load %arg14[%c5_95, %c0_96] : memref<8x512xf32, #tpu.memory_space<vmem>>, vector<1x256xf32>
    tpu.vector_store %arg14[%c5_95, %c0_96], %148 {strides = array<i32>} : memref<8x512xf32, #tpu.memory_space<vmem>>, vector<1x256xf32>,
    %150 = vector.extract_strided_slice %127 {offsets = [1, 1280], sizes = [1, 256], strides = [1, 1]} : vector<2x2048xf32> to vector<1x256xf32>
    %c5_97 = arith.constant 5 : index
    %c256_98 = arith.constant 256 : index
    %151 = vector.load %arg14[%c5_97, %c256_98] : memref<8x512xf32, #tpu.memory_space<vmem>>, vector<1x256xf32>
    tpu.vector_store %arg14[%c5_97, %c256_98], %150 {strides = array<i32>} : memref<8x512xf32, #tpu.memory_space<vmem>>, vector<1x256xf32>,
    %152 = vector.extract_strided_slice %127 {offsets = [0, 1536], sizes = [1, 256], strides = [1, 1]} : vector<2x2048xf32> to vector<1x256xf32>
    %c6_99 = arith.constant 6 : index
    %c0_100 = arith.constant 0 : index
    %153 = vector.load %arg14[%c6_99, %c0_100] : memref<8x512xf32, #tpu.memory_space<vmem>>, vector<1x256xf32>
    tpu.vector_store %arg14[%c6_99, %c0_100], %152 {strides = array<i32>} : memref<8x512xf32, #tpu.memory_space<vmem>>, vector<1x256xf32>,
    %154 = vector.extract_strided_slice %127 {offsets = [1, 1536], sizes = [1, 256], strides = [1, 1]} : vector<2x2048xf32> to vector<1x256xf32>
    %c6_101 = arith.constant 6 : index
    %c256_102 = arith.constant 256 : index
    %155 = vector.load %arg14[%c6_101, %c256_102] : memref<8x512xf32, #tpu.memory_space<vmem>>, vector<1x256xf32>
    tpu.vector_store %arg14[%c6_101, %c256_102], %154 {strides = array<i32>} : memref<8x512xf32, #tpu.memory_space<vmem>>, vector<1x256xf32>,
    %156 = vector.extract_strided_slice %127 {offsets = [0, 1792], sizes = [1, 256], strides = [1, 1]} : vector<2x2048xf32> to vector<1x256xf32>
    %c7_103 = arith.constant 7 : index
    %c0_104 = arith.constant 0 : index
    %157 = vector.load %arg14[%c7_103, %c0_104] : memref<8x512xf32, #tpu.memory_space<vmem>>, vector<1x256xf32>
    tpu.vector_store %arg14[%c7_103, %c0_104], %156 {strides = array<i32>} : memref<8x512xf32, #tpu.memory_space<vmem>>, vector<1x256xf32>,
    %158 = vector.extract_strided_slice %127 {offsets = [1, 1792], sizes = [1, 256], strides = [1, 1]} : vector<2x2048xf32> to vector<1x256xf32>
    %c7_105 = arith.constant 7 : index
    %c256_106 = arith.constant 256 : index
    %159 = vector.load %arg14[%c7_105, %c256_106] : memref<8x512xf32, #tpu.memory_space<vmem>>, vector<1x256xf32>
    tpu.vector_store %arg14[%c7_105, %c256_106], %158 {strides = array<i32>} : memref<8x512xf32, #tpu.memory_space<vmem>>, vector<1x256xf32>,
    %c0_107 = arith.constant 0 : index
    %c0_108 = arith.constant 0 : index
    %160 = vector.load %arg14[%c0_107, %c0_108] : memref<8x512xf32, #tpu.memory_space<vmem>>, vector<8x512xf32>
    %c17_i32_109 = arith.constant 17 : i32
    %161 = tpu.dynamic_rotate %160 by %c17_i32_109 dim 1 : vector<8x512xf32>, i32 -> vector<8x512xf32>
    %162 = vector.extract_strided_slice %0 {offsets = [0, 0], sizes = [1, 512], strides = [1, 1]} : vector<9x512xf32> to vector<1x512xf32>
    %163 = vector.broadcast %162 : vector<1x512xf32> to vector<8x512xf32>
    %164 = arith.mulf %161, %163 : vector<8x512xf32>
    %c0_110 = arith.constant 0 : index
    %c0_111 = arith.constant 0 : index
    %c0_112 = arith.constant 0 : index
    %165 = vector.load %arg9[%c0_110, %c0_111, %c0_112] : memref<9x4x8xf32, #tpu.memory_space<vmem>>, vector<1x4x8xf32>
    %166 = vector.shape_cast %165 : vector<1x4x8xf32> to vector<4x8xf32>
    %cst_113 = arith.constant dense<0.000000e+00> : vector<4x512xf32>
    %167 = tpu.matmul %166, %164, %cst_113 {dimension_numbers = #tpu.dot_dimension_numbers<[1], [0], [0], [1], [0, 0, 1, 1], [], []>} : vector<4x8xf32>, vector<8x512xf32>, vector<4x512xf32> -> vector<4x512xf32>
    %c16_i32_114 = arith.constant 16 : i32
    %168 = tpu.dynamic_rotate %160 by %c16_i32_114 dim 1 : vector<8x512xf32>, i32 -> vector<8x512xf32>
    %169 = vector.extract_strided_slice %0 {offsets = [1, 0], sizes = [1, 512], strides = [1, 1]} : vector<9x512xf32> to vector<1x512xf32>
    %170 = vector.broadcast %169 : vector<1x512xf32> to vector<8x512xf32>
    %171 = arith.mulf %168, %170 : vector<8x512xf32>
    %c1_115 = arith.constant 1 : index
    %c0_116 = arith.constant 0 : index
    %c0_117 = arith.constant 0 : index
    %172 = vector.load %arg9[%c1_115, %c0_116, %c0_117] : memref<9x4x8xf32, #tpu.memory_space<vmem>>, vector<1x4x8xf32>
    %173 = vector.shape_cast %172 : vector<1x4x8xf32> to vector<4x8xf32>
    %cst_118 = arith.constant dense<0.000000e+00> : vector<4x512xf32>
    %174 = tpu.matmul %173, %171, %cst_118 {dimension_numbers = #tpu.dot_dimension_numbers<[1], [0], [0], [1], [0, 0, 1, 1], [], []>} : vector<4x8xf32>, vector<8x512xf32>, vector<4x512xf32> -> vector<4x512xf32>
    %175 = arith.addf %167, %174 : vector<4x512xf32>
    %c15_i32_119 = arith.constant 15 : i32
    %176 = tpu.dynamic_rotate %160 by %c15_i32_119 dim 1 : vector<8x512xf32>, i32 -> vector<8x512xf32>
    %177 = vector.extract_strided_slice %0 {offsets = [2, 0], sizes = [1, 512], strides = [1, 1]} : vector<9x512xf32> to vector<1x512xf32>
    %178 = vector.broadcast %177 : vector<1x512xf32> to vector<8x512xf32>
    %179 = arith.mulf %176, %178 : vector<8x512xf32>
    %c2_120 = arith.constant 2 : index
    %c0_121 = arith.constant 0 : index
    %c0_122 = arith.constant 0 : index
    %180 = vector.load %arg9[%c2_120, %c0_121, %c0_122] : memref<9x4x8xf32, #tpu.memory_space<vmem>>, vector<1x4x8xf32>
    %181 = vector.shape_cast %180 : vector<1x4x8xf32> to vector<4x8xf32>
    %cst_123 = arith.constant dense<0.000000e+00> : vector<4x512xf32>
    %182 = tpu.matmul %181, %179, %cst_123 {dimension_numbers = #tpu.dot_dimension_numbers<[1], [0], [0], [1], [0, 0, 1, 1], [], []>} : vector<4x8xf32>, vector<8x512xf32>, vector<4x512xf32> -> vector<4x512xf32>
    %183 = arith.addf %175, %182 : vector<4x512xf32>
    %c1_i32_124 = arith.constant 1 : i32
    %184 = tpu.dynamic_rotate %160 by %c1_i32_124 dim 1 : vector<8x512xf32>, i32 -> vector<8x512xf32>
    %185 = vector.extract_strided_slice %0 {offsets = [3, 0], sizes = [1, 512], strides = [1, 1]} : vector<9x512xf32> to vector<1x512xf32>
    %186 = vector.broadcast %185 : vector<1x512xf32> to vector<8x512xf32>
    %187 = arith.mulf %184, %186 : vector<8x512xf32>
    %c3_125 = arith.constant 3 : index
    %c0_126 = arith.constant 0 : index
    %c0_127 = arith.constant 0 : index
    %188 = vector.load %arg9[%c3_125, %c0_126, %c0_127] : memref<9x4x8xf32, #tpu.memory_space<vmem>>, vector<1x4x8xf32>
    %189 = vector.shape_cast %188 : vector<1x4x8xf32> to vector<4x8xf32>
    %cst_128 = arith.constant dense<0.000000e+00> : vector<4x512xf32>
    %190 = tpu.matmul %189, %187, %cst_128 {dimension_numbers = #tpu.dot_dimension_numbers<[1], [0], [0], [1], [0, 0, 1, 1], [], []>} : vector<4x8xf32>, vector<8x512xf32>, vector<4x512xf32> -> vector<4x512xf32>
    %191 = arith.addf %183, %190 : vector<4x512xf32>
    %c4_129 = arith.constant 4 : index
    %c0_130 = arith.constant 0 : index
    %c0_131 = arith.constant 0 : index
    %192 = vector.load %arg9[%c4_129, %c0_130, %c0_131] : memref<9x4x8xf32, #tpu.memory_space<vmem>>, vector<1x4x8xf32>
    %193 = vector.shape_cast %192 : vector<1x4x8xf32> to vector<4x8xf32>
    %cst_132 = arith.constant dense<0.000000e+00> : vector<4x512xf32>
    %194 = tpu.matmul %193, %160, %cst_132 {dimension_numbers = #tpu.dot_dimension_numbers<[1], [0], [0], [1], [0, 0, 1, 1], [], []>} : vector<4x8xf32>, vector<8x512xf32>, vector<4x512xf32> -> vector<4x512xf32>
    %195 = arith.addf %191, %194 : vector<4x512xf32>
    %c511_i32_133 = arith.constant 511 : i32
    %196 = tpu.dynamic_rotate %160 by %c511_i32_133 dim 1 : vector<8x512xf32>, i32 -> vector<8x512xf32>
    %197 = vector.extract_strided_slice %0 {offsets = [5, 0], sizes = [1, 512], strides = [1, 1]} : vector<9x512xf32> to vector<1x512xf32>
    %198 = vector.broadcast %197 : vector<1x512xf32> to vector<8x512xf32>
    %199 = arith.mulf %196, %198 : vector<8x512xf32>
    %c5_134 = arith.constant 5 : index
    %c0_135 = arith.constant 0 : index
    %c0_136 = arith.constant 0 : index
    %200 = vector.load %arg9[%c5_134, %c0_135, %c0_136] : memref<9x4x8xf32, #tpu.memory_space<vmem>>, vector<1x4x8xf32>
    %201 = vector.shape_cast %200 : vector<1x4x8xf32> to vector<4x8xf32>
    %cst_137 = arith.constant dense<0.000000e+00> : vector<4x512xf32>
    %202 = tpu.matmul %201, %199, %cst_137 {dimension_numbers = #tpu.dot_dimension_numbers<[1], [0], [0], [1], [0, 0, 1, 1], [], []>} : vector<4x8xf32>, vector<8x512xf32>, vector<4x512xf32> -> vector<4x512xf32>
    %203 = arith.addf %195, %202 : vector<4x512xf32>
    %c497_i32_138 = arith.constant 497 : i32
    %204 = tpu.dynamic_rotate %160 by %c497_i32_138 dim 1 : vector<8x512xf32>, i32 -> vector<8x512xf32>
    %205 = vector.extract_strided_slice %0 {offsets = [6, 0], sizes = [1, 512], strides = [1, 1]} : vector<9x512xf32> to vector<1x512xf32>
    %206 = vector.broadcast %205 : vector<1x512xf32> to vector<8x512xf32>
    %207 = arith.mulf %204, %206 : vector<8x512xf32>
    %c6_139 = arith.constant 6 : index
    %c0_140 = arith.constant 0 : index
    %c0_141 = arith.constant 0 : index
    %208 = vector.load %arg9[%c6_139, %c0_140, %c0_141] : memref<9x4x8xf32, #tpu.memory_space<vmem>>, vector<1x4x8xf32>
    %209 = vector.shape_cast %208 : vector<1x4x8xf32> to vector<4x8xf32>
    %cst_142 = arith.constant dense<0.000000e+00> : vector<4x512xf32>
    %210 = tpu.matmul %209, %207, %cst_142 {dimension_numbers = #tpu.dot_dimension_numbers<[1], [0], [0], [1], [0, 0, 1, 1], [], []>} : vector<4x8xf32>, vector<8x512xf32>, vector<4x512xf32> -> vector<4x512xf32>
    %211 = arith.addf %203, %210 : vector<4x512xf32>
    %c496_i32_143 = arith.constant 496 : i32
    %212 = tpu.dynamic_rotate %160 by %c496_i32_143 dim 1 : vector<8x512xf32>, i32 -> vector<8x512xf32>
    %213 = vector.extract_strided_slice %0 {offsets = [7, 0], sizes = [1, 512], strides = [1, 1]} : vector<9x512xf32> to vector<1x512xf32>
    %214 = vector.broadcast %213 : vector<1x512xf32> to vector<8x512xf32>
    %215 = arith.mulf %212, %214 : vector<8x512xf32>
    %c7_144 = arith.constant 7 : index
    %c0_145 = arith.constant 0 : index
    %c0_146 = arith.constant 0 : index
    %216 = vector.load %arg9[%c7_144, %c0_145, %c0_146] : memref<9x4x8xf32, #tpu.memory_space<vmem>>, vector<1x4x8xf32>
    %217 = vector.shape_cast %216 : vector<1x4x8xf32> to vector<4x8xf32>
    %cst_147 = arith.constant dense<0.000000e+00> : vector<4x512xf32>
    %218 = tpu.matmul %217, %215, %cst_147 {dimension_numbers = #tpu.dot_dimension_numbers<[1], [0], [0], [1], [0, 0, 1, 1], [], []>} : vector<4x8xf32>, vector<8x512xf32>, vector<4x512xf32> -> vector<4x512xf32>
    %219 = arith.addf %211, %218 : vector<4x512xf32>
    %c495_i32_148 = arith.constant 495 : i32
    %220 = tpu.dynamic_rotate %160 by %c495_i32_148 dim 1 : vector<8x512xf32>, i32 -> vector<8x512xf32>
    %221 = vector.extract_strided_slice %0 {offsets = [8, 0], sizes = [1, 512], strides = [1, 1]} : vector<9x512xf32> to vector<1x512xf32>
    %222 = vector.broadcast %221 : vector<1x512xf32> to vector<8x512xf32>
    %223 = arith.mulf %220, %222 : vector<8x512xf32>
    %c8_149 = arith.constant 8 : index
    %c0_150 = arith.constant 0 : index
    %c0_151 = arith.constant 0 : index
    %224 = vector.load %arg9[%c8_149, %c0_150, %c0_151] : memref<9x4x8xf32, #tpu.memory_space<vmem>>, vector<1x4x8xf32>
    %225 = vector.shape_cast %224 : vector<1x4x8xf32> to vector<4x8xf32>
    %cst_152 = arith.constant dense<0.000000e+00> : vector<4x512xf32>
    %226 = tpu.matmul %225, %223, %cst_152 {dimension_numbers = #tpu.dot_dimension_numbers<[1], [0], [0], [1], [0, 0, 1, 1], [], []>} : vector<4x8xf32>, vector<8x512xf32>, vector<4x512xf32> -> vector<4x512xf32>
    %227 = arith.addf %219, %226 : vector<4x512xf32>
    %c0_153 = arith.constant 0 : index
    %c0_154 = arith.constant 0 : index
    %228 = vector.load %arg10[%c0_153, %c0_154] : memref<4x1xf32, #tpu.memory_space<vmem>>, vector<4x1xf32>
    %229 = vector.broadcast %228 : vector<4x1xf32> to vector<4x512xf32>
    %230 = arith.addf %227, %229 : vector<4x512xf32>
    %231 = math.tanh %230 : vector<4x512xf32>
    %c0_155 = arith.constant 0 : index
    %c0_156 = arith.constant 0 : index
    %232 = vector.load %arg11[%c0_155, %c0_156] : memref<4x512xf32, #tpu.memory_space<vmem>>, vector<4x512xf32>
    tpu.vector_store %arg11[%c0_155, %c0_156], %231 {strides = array<i32>} : memref<4x512xf32, #tpu.memory_space<vmem>>, vector<4x512xf32>,
    return
  }
}

</mosaic_0001>

<bundles_post_ra>
// kernel: vae_forward.1
= control target key start
LH: loop header
LB: loop body
LE: loop exit
PB: predicated region body
PF: predicated region fallthrough
CT: control target
= control target key end

     0   :  { %v7969_v2 = vmov 0.0   ;;  %s6471_s25 = smov 16   ;;  %s6473_s26 = smov 15   ;;  %v65_v5 = vlaneseq  ;;  %v6479_v7 = vmov 0   ;;  %vm132_vm1 = vcmask 1043456   ;;  %s7956_s1 = inlined_call_operand.vmem [shape: f32[4,512], index: 1, kind: input, shape index: {}]   ;;  %s7957_s3 = inlined_call_operand.vmem [shape: f32[8,1], index: 3, kind: input, shape index: {}]   ;;  %s7958_s4 = inlined_call_operand.vmem [shape: bf16[2048,64], index: 4, kind: input, shape index: {}]   ;;  %s7959_s0 = inlined_call_operand.vmem [shape: f32[9,512], index: 0, kind: input, shape index: {}]   ;;  %s7960_s2 = inlined_call_operand.vmem [shape: f32[9,8,4], index: 2, kind: input, shape index: {}]   ;;  %s7961_s7 = inlined_call_operand.vmem [shape: bf16[32,2048], index: 7, kind: input, shape index: {}]   ;;  %s7962_s5 = inlined_call_operand.vmem [shape: f32[1,64], index: 5, kind: input, shape index: {}]   ;;  %s7963_s12 = inlined_call_operand.vmem [shape: f32[2,64], index: 12, kind: output, shape index: {1}]   ;;  %s7964_s6 = inlined_call_operand.vmem [shape: f32[2,32], index: 6, kind: input, shape index: {}]   ;;  %s7965_s8 = inlined_call_operand.vmem [shape: f32[1,2048], index: 8, kind: input, shape index: {}]   ;;  %s7966_s10 = inlined_call_operand.vmem [shape: f32[4,1], index: 10, kind: input, shape index: {}]   ;;  %s7967_s9 = inlined_call_operand.vmem [shape: f32[9,4,8], index: 9, kind: input, shape index: {}]   ;;  %s7968_s11 = inlined_call_operand.vmem [shape: f32[4,512], index: 11, kind: output, shape index: {0}]  }
   0x1   :  { %v6551_v0 = vld [vmem:[%s7956_s1 + $0x8] sm:$0xff]  ;;  %v6556_v1 = vld [vmem:[%s7956_s1] sm:$0xff]  ;;  %209 = vmatprep.mubr.f32.mxu0 %v7969_v2  ;;  %280 = vmatprep.mubr.f32.mxu1 %v7969_v2  ;;  %s6472_s1 = smov 17   ;;  %s6474_s27 = smov 1   ;;  %v6667_v16 = vld [vmem:[%s7959_s0 + $0x10] sm:$0xff]  ;;  %vm128_vm3 = vcmask 31744  }
   0x2   :  { %97 = vrot.lane.b32.xlu1 %v6551_v0, %s6471_s25  ;;  %93 = vrot.lane.b32.xlu0 %v6556_v1, %s6471_s25  ;;  %v6566_v3 = vcombine.high %v6551_v0, %v6551_v0  ;;  %v6570_v4 = vcombine.high %v6556_v1, %v6556_v1  ;;  %s6475_s28 = smov 127   ;;  %s6476_s29 = smov 113   ;;  %v6629_v6 = vshrl.u32 %v65_v5, 7  ;;  %v1779_v8 = vld [vmem:[%s7957_s3] sm:$0xff]  ;;  %v6641_v9 = vand.u32 127, %v65_v5  ;;  %v6672_v17 = vld [vmem:[%s7959_s0 + $0x8] sm:$0xff] }
   0x3   :  { %s6477_s30 = smov 112   ;;  %s6478_s13 = smov 111   ;;  %6320 = vset.pattern.permute.xlu0 %v6479_v7  ;;  %6321 = vset.pattern.permute.xlu1 %v6479_v7  ;;  %v6662_v15 = vld [vmem:[%s7959_s0] sm:$0xff]  ;;  %v6677_v18 = vld [vmem:[%s7959_s0 + $0x18] sm:$0xff]  ;;  %v5806_v32 = vld [vmem:[%s7960_s2 + $0x8] sm:$0xff]  ;;  %vm7119_vm10 = vcmp.lt.s32.totalorder %v65_v5, 256 }
   0x4   :  { %v6644_v10 = vsub.s32 1, %v6629_v6  ;;  %v6647_v11 = vsub.s32 0, %v6629_v6  ;;  %v6650_v12 = vsub.s32 2, %v6629_v6  ;;  %v6653_v13 = vsub.s32 3, %v6629_v6  ;;  %v92_v49 = vld [vmem:[%s7960_s2] sm:$0xff]  ;;  %s6482_s19 = smov 96  }
   0x5   :  { %v6656_v14 = vsub.s32 5, %v6629_v6  ;;  %vm101_vm0 = vcmp.lt.s32.totalorder %v6641_v9, 16  ;;  %vm67_vm2 = vcmp.lt.s32.totalorder %v6641_v9, 17  ;;  %vm452_vm4 = vcmp.lt.s32.totalorder %v6641_v9, 15 }
   0x6   :  { %99 = vrot.lane.b32.xlu1 %v6566_v3, %s6471_s25  ;;  %95 = vrot.lane.b32.xlu0 %v6570_v4, %s6471_s25  ;;  %v6682_v21 = vrot.slane %v6662_v15, %v6644_v10  ;;  %v6686_v22 = vrot.slane %v6667_v16, %v6644_v10  ;;  %v6690_v23 = vrot.slane %v6672_v17, %v6644_v10  ;;  %vm648_vm5 = vcmp.lt.s32.totalorder %v6641_v9, 1 }
   0x7   :  { %v6694_v24 = vrot.slane %v6677_v18, %v6644_v10  ;;  %v6698_v27 = vrot.slane %v6672_v17, %v6647_v11  ;;  %v6724_v40 = vrot.slane %v6662_v15, %v6647_v11  ;;  %v6731_v42 = vrot.slane %v6667_v16, %v6647_v11 }
   0x8   :  { %v6735_v43 = vrot.slane %v6677_v18, %v6647_v11  ;;  %v6754_v53 = vrot.slane %v6672_v17, %v6650_v12  ;;  %v6764_v57 = vrot.slane %v6662_v15, %v6650_v12  ;;  %v6771_v59 = vrot.slane %v6667_v16, %v6650_v12 }
   0x9   :  { %v6775_v60 = vrot.slane %v6677_v18, %v6650_v12  ;;  %vm1003_vm6 = vcmp.lt.s32.totalorder %v6641_v9, 127  ;;  %vm1199_vm7 = vcmp.lt.s32.totalorder %v6641_v9, 113  ;;  %vm1395_vm8 = vcmp.lt.s32.totalorder %v6641_v9, 112 }
   0xa   :  { %59 = vrot.lane.b32.xlu1 %v6570_v4, %s6472_s1  ;;  %57 = vrot.lane.b32.xlu0 %v6556_v1, %s6472_s1  ;;  %vm1591_vm9 = vcmp.lt.s32.totalorder %v6641_v9, 111  ;;  %vm3407_vm11 = vcmask 517120   ;;  %vm3696_vm12 = vcmask 261120   ;;  %vm4330_vm13 = vcmask 64512   ;;  %v6469_v9 = vld [vmem:[%s7959_s0 + $0x30] ss:$0 sm:$0xff] }
   0xe   :  { %63 = vrot.lane.b32.xlu1 %v6566_v3, %s6472_s1  ;;  %61 = vrot.lane.b32.xlu0 %v6551_v0, %s6472_s1 }
  0x12   :  { %446 = vrot.lane.b32.xlu1 %v6570_v4, %s6473_s26  ;;  %444 = vrot.lane.b32.xlu0 %v6556_v1, %s6473_s26 }
  0x16   :  { %450 = vrot.lane.b32.xlu1 %v6566_v3, %s6473_s26  ;;  %448 = vrot.lane.b32.xlu0 %v6551_v0, %s6473_s26 }
  0x1a   :  { %642 = vrot.lane.b32.xlu1 %v6570_v4, %s6474_s27  ;;  %640 = vrot.lane.b32.xlu0 %v6556_v1, %s6474_s27 }
  0x1e   :  { %646 = vrot.lane.b32.xlu1 %v6566_v3, %s6474_s27  ;;  %644 = vrot.lane.b32.xlu0 %v6551_v0, %s6474_s27 }
  0x22   :  { %995 = vrot.lane.b32.xlu0 %v6556_v1, %s6475_s28  ;;  %997 = vrot.lane.b32.xlu1 %v6570_v4, %s6475_s28 }
  0x26   :  { %999 = vrot.lane.b32.xlu0 %v6551_v0, %s6475_s28  ;;  %1001 = vrot.lane.b32.xlu1 %v6566_v3, %s6475_s28 }
  0x2a   :  { %1191 = vrot.lane.b32.xlu0 %v6556_v1, %s6476_s29  ;;  %1193 = vrot.lane.b32.xlu1 %v6570_v4, %s6476_s29 }
  0x2e   :  { %1195 = vrot.lane.b32.xlu0 %v6551_v0, %s6476_s29  ;;  %1197 = vrot.lane.b32.xlu1 %v6566_v3, %s6476_s29 }
  0x32   :  { %1387 = vrot.lane.b32.xlu0 %v6556_v1, %s6477_s30  ;;  %1389 = vrot.lane.b32.xlu1 %v6570_v4, %s6477_s30 }
  0x36   :  { %1391 = vrot.lane.b32.xlu0 %v6551_v0, %s6477_s30  ;;  %1393 = vrot.lane.b32.xlu1 %v6566_v3, %s6477_s30 }
  0x3a   :  { %1583 = vrot.lane.b32.xlu0 %v6556_v1, %s6478_s13  ;;  %1585 = vrot.lane.b32.xlu1 %v6570_v4, %s6478_s13 }
  0x3e   :  { %1587 = vrot.lane.b32.xlu0 %v6551_v0, %s6478_s13  ;;  %1589 = vrot.lane.b32.xlu1 %v6566_v3, %s6478_s13 }
  0x42   :  { %1782 = vperm.xlu0 %6320, %v1779_v8  }
  0x74   :  { %v98_v19 = vpop.permute.xlu1 %97  ;;  %v94_v20 = vpop.permute.xlu0 %93 }
  0x78   :  { %v100_v25 = vpop.permute.xlu1 %99  ;;  %v96_v26 = vpop.permute.xlu0 %95 }
  0x79   :  { %v102_v28 = vsel %vm101_vm0, %v98_v19, %v100_v25  ;;  %v105_v29 = vsel %vm101_vm0, %v100_v25, %v94_v20  ;;  %v103_v30 = vsel %vm101_vm0, %v96_v26, %v98_v19  ;;  %v104_v31 = vsel %vm101_vm0, %v94_v20, %v96_v26  ;;  %v5819_v20 = vld [vmem:[%s7960_s2 + $0x10] sm:$0xff] }
  0x7a   :  { %v122_v33 = vmul.f32 %v6682_v21, %v105_v29  ;;  %v124_v34 = vmul.f32 %v6686_v22, %v103_v30  ;;  %v123_v35 = vmul.f32 %v6690_v23, %v104_v31  ;;  %v125_v36 = vmul.f32 %v6694_v24, %v102_v28 }
  0x7b   :  { %v6794_v29 = vrot.slane %v6672_v17, %v6653_v13 }
  0x7c   :  { %v60_v37 = vpop.permute.xlu1 %59  ;;  %v58_v38 = vpop.permute.xlu0 %57  ;;  %5807 = vmatprep.subr.msk.mxu0 %vm132_vm1, %v123_v35  ;;  %5810 = vmatprep.subr.msk.mxu1 %vm132_vm1, %v125_v36  ;;  %v6811_v35 = vrot.slane %v6667_v16, %v6653_v13  ;;  %v6815_v36 = vrot.slane %v6677_v18, %v6653_v13 }
  0x7d   :  { %v70_v39 = vsel %vm67_vm2, %v58_v38, %v60_v37  ;;  %5808 = vmatpush1.msk.msra.mxu0 %vm132_vm1, %v122_v33  ;;  %5811 = vmatpush1.msk.msra.mxu1 %vm132_vm1, %v124_v34  ;;  %v6803_v33 = vrot.slane %v6662_v15, %v6653_v13 }
  0x7e   :  { %v89_v41 = vmul.f32 %v6698_v27, %v70_v39  ;;  %5809 = vmatmul.mubr.msk.f32.vlgmr.msra.gmra.mrb[0].mxu0 %vm128_vm3, %v5806_v32  ;;  %5812 = vmatmul.mubr.msk.f32.vlgmr.msra.gmra.mrb[0].mxu1 %vm128_vm3, %v5806_v32 }
  0x7f   :  { %366 = vmatprep.mubr.f32.mxu0 %v7969_v2  ;;  %437 = vmatprep.mubr.f32.mxu1 %v7969_v2 }
  0x80   :  { %v64_v44 = vpop.permute.xlu1 %63  ;;  %v62_v45 = vpop.permute.xlu0 %61  ;;  %5813 = vmatprep.subr.msk.mxu0 %vm132_vm1, %v89_v41 }
  0x81   :  { %v71_v46 = vsel %vm67_vm2, %v64_v44, %v58_v38  ;;  %v68_v47 = vsel %vm67_vm2, %v62_v45, %v64_v44  ;;  %v69_v48 = vsel %vm67_vm2, %v60_v37, %v62_v45  ;;  %v5826_v45 = vld [vmem:[%s7960_s2 + $0x18] sm:$0xff] }
  0x82   :  { %v88_v50 = vmul.f32 %v6724_v40, %v71_v46  ;;  %v90_v51 = vmul.f32 %v6731_v42, %v69_v48  ;;  %v91_v52 = vmul.f32 %v6735_v43, %v68_v47 }
  0x84   :  { %v447_v54 = vpop.permute.xlu1 %446  ;;  %v445_v55 = vpop.permute.xlu0 %444  ;;  %5814 = vmatpush1.msk.msra.mxu0 %vm132_vm1, %v88_v50  ;;  %5816 = vmatprep.subr.msk.mxu1 %vm132_vm1, %v91_v52  ;;  %v6845_v52 = vrot.slane %v6677_v18, %v6656_v14 }
  0x85   :  { %v455_v56 = vsel %vm452_vm4, %v445_v55, %v447_v54  ;;  %5817 = vmatpush1.msk.msra.mxu1 %vm132_vm1, %v90_v51  ;;  %v6841_v51 = vrot.slane %v6672_v17, %v6656_v14 }
  0x86   :  { %v474_v58 = vmul.f32 %v6754_v53, %v455_v56  ;;  %5815 = vmatmul.mubr.msk.f32.vlgmr.msra.gmra.mrb[0].mxu0 %vm128_vm3, %v92_v49  ;;  %5818 = vmatmul.mubr.msk.f32.vlgmr.msra.gmra.mrb[0].mxu1 %vm128_vm3, %v92_v49 }
  0x87   :  { %558 = vmatprep.mubr.f32.mxu0 %v7969_v2  ;;  %629 = vmatprep.mubr.f32.mxu1 %v7969_v2 }
  0x88   :  { %v451_v61 = vpop.permute.xlu1 %450  ;;  %v449_v62 = vpop.permute.xlu0 %448  ;;  %5820 = vmatprep.subr.msk.mxu0 %vm132_vm1, %v474_v58 }
  0x89   :  { %v456_v63 = vsel %vm452_vm4, %v451_v61, %v445_v55  ;;  %v453_v8 = vsel %vm452_vm4, %v449_v62, %v451_v61  ;;  %v454_v19 = vsel %vm452_vm4, %v447_v54, %v449_v62  ;;  %v6849_v54 = vrot.slane %v6662_v15, %v6656_v14 }
  0x8a   :  { %v473_v25 = vmul.f32 %v6764_v57, %v456_v63  ;;  %v475_v26 = vmul.f32 %v6771_v59, %v454_v19  ;;  %v476_v28 = vmul.f32 %v6775_v60, %v453_v8  ;;  %v6853_v55 = vrot.slane %v6667_v16, %v6656_v14 }
  0x8b   :  { %v6874_v8 = vsub.s32 6, %v6629_v6 }
  0x8c   :  { %v643_v30 = vpop.permute.xlu1 %642  ;;  %v641_v31 = vpop.permute.xlu0 %640  ;;  %5821 = vmatpush1.msk.msra.mxu0 %vm132_vm1, %v473_v25  ;;  %5823 = vmatprep.subr.msk.mxu1 %vm132_vm1, %v476_v28 }
  0x8d   :  { %v651_v32 = vsel %vm648_vm5, %v641_v31, %v643_v30  ;;  %5824 = vmatpush1.msk.msra.mxu1 %vm132_vm1, %v475_v26  ;;  %v6888_v28 = vrot.slane %v6672_v17, %v6874_v8 }
  0x8e   :  { %v670_v34 = vmul.f32 %v6794_v29, %v651_v32  ;;  %5822 = vmatmul.mubr.msk.f32.vlgmr.msra.gmra.mrb[0].mxu0 %vm128_vm3, %v5819_v20  ;;  %5825 = vmatmul.mubr.msk.f32.vlgmr.msra.gmra.mrb[0].mxu1 %vm128_vm3, %v5819_v20  ;;  %v5833_v20 = vld [vmem:[%s7960_s2 + $0x20] sm:$0xff]  ;;  %v6901_v32 = vrot.slane %v6667_v16, %v6874_v8 }
  0x8f   :  { %754 = vmatprep.mubr.f32.mxu0 %v7969_v2  ;;  %825 = vmatprep.mubr.f32.mxu1 %v7969_v2 }
  0x90   :  { %v647_v37 = vpop.permute.xlu1 %646  ;;  %v645_v38 = vpop.permute.xlu0 %644  ;;  %5827 = vmatprep.subr.msk.mxu0 %vm132_vm1, %v670_v34 }
  0x91   :  { %v652_v39 = vsel %vm648_vm5, %v647_v37, %v641_v31  ;;  %v649_v41 = vsel %vm648_vm5, %v645_v38, %v647_v37  ;;  %v650_v44 = vsel %vm648_vm5, %v643_v30, %v645_v38  ;;  %v6892_v30 = vrot.slane %v6677_v18, %v6874_v8 }
  0x92   :  { %v669_v46 = vmul.f32 %v6803_v33, %v652_v39  ;;  %v671_v47 = vmul.f32 %v6811_v35, %v650_v44  ;;  %v672_v48 = vmul.f32 %v6815_v36, %v649_v41  ;;  %v6896_v31 = vrot.slane %v6662_v15, %v6874_v8 }
  0x94   :  { %5828 = vmatpush1.msk.msra.mxu0 %vm132_vm1, %v669_v46  ;;  %5830 = vmatprep.subr.msk.mxu1 %vm132_vm1, %v672_v48  ;;  %v996_v49 = vpop.permute.xlu0 %995  ;;  %v998_v50 = vpop.permute.xlu1 %997 }
  0x95   :  { %5831 = vmatpush1.msk.msra.mxu1 %vm132_vm1, %v671_v47  ;;  %5834 = vmatprep.subr.msk.mxu0 %vm132_vm1, %v6570_v4  ;;  %v1006_v4 = vsel %vm1003_vm6, %v996_v49, %v998_v50  ;;  %v6917_v47 = vsub.s32 7, %v6629_v6 }
  0x96   :  { %5829 = vmatmul.mubr.msk.f32.vlgmr.msra.gmra.mrb[0].mxu0 %vm128_vm3, %v5826_v45  ;;  %5832 = vmatmul.mubr.msk.f32.vlgmr.msra.gmra.mrb[0].mxu1 %vm128_vm3, %v5826_v45 }
  0x97   :  { %5837 = vmatprep.subr.msk.mxu1 %vm132_vm1, %v6566_v3  ;;  %5835 = vmatpush1.msk.msra.mxu0 %vm132_vm1, %v6556_v1 }
  0x98   :  { %v1000_v56 = vpop.permute.xlu0 %999  ;;  %v1002_v58 = vpop.permute.xlu1 %1001  ;;  %913 = vmatprep.mubr.f32.mxu0 %v7969_v2  ;;  %5838 = vmatpush1.msk.msra.mxu1 %vm132_vm1, %v6551_v0  ;;  %v1024_v0 = vmul.f32 %v6849_v54, %v1006_v4 }
  0x99   :  { %v1005_v61 = vsel %vm1003_vm6, %v998_v50, %v1000_v56  ;;  %v1004_v62 = vsel %vm1003_vm6, %v1000_v56, %v1002_v58  ;;  %v1007_v3 = vsel %vm1003_vm6, %v1002_v58, %v996_v49  ;;  %984 = vmatprep.mubr.f32.mxu1 %v7969_v2  ;;  %v5840_v50 = vld [vmem:[%s7960_s2 + $0x28] sm:$0xff]  ;;  %v6931_v58 = vrot.slane %v6672_v17, %v6917_v47 }
  0x9a   :  { %v1025_v1 = vmul.f32 %v6841_v51, %v1005_v61  ;;  %v1027_v63 = vmul.f32 %v6845_v52, %v1007_v3  ;;  %v1026_v19 = vmul.f32 %v6853_v55, %v1004_v62  ;;  %v6935_v61 = vrot.slane %v6677_v18, %v6917_v47 }
  0x9b   :  { %v6939_v62 = vrot.slane %v6662_v15, %v6917_v47  ;;  %v6944_v3 = vrot.slane %v6667_v16, %v6917_v47 }
  0x9c   :  { %v1192_v25 = vpop.permute.xlu0 %1191  ;;  %5841 = vmatprep.subr.msk.mxu0 %vm132_vm1, %v1025_v1  ;;  %v1194_v26 = vpop.permute.xlu1 %1193  ;;  %5844 = vmatprep.subr.msk.mxu1 %vm132_vm1, %v1027_v63 }
  0x9d   :  { %v1202_v34 = vsel %vm1199_vm7, %v1192_v25, %v1194_v26 }
  0x9e   :  { %5836 = vmatmul.mubr.msk.f32.vlgmr.msra.gmra.mrb[0].mxu0 %vm128_vm3, %v5833_v20  ;;  %5839 = vmatmul.mubr.msk.f32.vlgmr.msra.gmra.mrb[0].mxu1 %vm128_vm3, %v5833_v20  ;;  %v1220_v48 = vmul.f32 %v6896_v31, %v1202_v34 }
  0x9f   :  { %5842 = vmatpush1.msk.msra.mxu0 %vm132_vm1, %v1024_v0  ;;  %5845 = vmatpush1.msk.msra.mxu1 %vm132_vm1, %v1026_v19 }
  0xa0   :  { %v1196_v37 = vpop.permute.xlu0 %1195  ;;  %v1198_v38 = vpop.permute.xlu1 %1197  ;;  %1109 = vmatprep.mubr.f32.mxu0 %v7969_v2  ;;  %1180 = vmatprep.mubr.f32.mxu1 %v7969_v2 }
  0xa1   :  { %v1201_v39 = vsel %vm1199_vm7, %v1194_v26, %v1196_v37  ;;  %v1200_v41 = vsel %vm1199_vm7, %v1196_v37, %v1198_v38  ;;  %v1203_v44 = vsel %vm1199_vm7, %v1198_v38, %v1192_v25  ;;  %v5847_v26 = vld [vmem:[%s7960_s2 + $0x30] sm:$0xff]  ;;  %v5862_v38 = vld [vmem:[%s7959_s0 + $0x28] ss:$0 sm:$0xff] }
  0xa2   :  { %v1221_v45 = vmul.f32 %v6888_v28, %v1201_v39  ;;  %v1223_v46 = vmul.f32 %v6892_v30, %v1203_v44  ;;  %v1222_v49 = vmul.f32 %v6901_v32, %v1200_v41  ;;  %v5864_v39 = vld [vmem:[%s7959_s0 + $0x38] ss:$0 sm:$0xff]  ;;  %v5861_v41 = vld [vmem:[%s7959_s0 + $0x20] ss:$0 sm:$0xff] }
  0xa4   :  { %v1388_v4 = vpop.permute.xlu0 %1387  ;;  %5848 = vmatprep.subr.msk.mxu0 %vm132_vm1, %v1221_v45  ;;  %v1390_v56 = vpop.permute.xlu1 %1389  ;;  %5851 = vmatprep.subr.msk.mxu1 %vm132_vm1, %v1223_v46 }
  0xa5   :  { %v1398_v17 = vsel %vm1395_vm8, %v1388_v4, %v1390_v56 }
  0xa6   :  { %5843 = vmatmul.mubr.msk.f32.vlgmr.msra.gmra.mrb[0].mxu0 %vm128_vm3, %v5840_v50  ;;  %5846 = vmatmul.mubr.msk.f32.vlgmr.msra.gmra.mrb[0].mxu1 %vm128_vm3, %v5840_v50  ;;  %v1416_v20 = vmul.f32 %v6939_v62, %v1398_v17 }
  0xa7   :  { %5849 = vmatpush1.msk.msra.mxu0 %vm132_vm1, %v1220_v48  ;;  %5852 = vmatpush1.msk.msra.mxu1 %vm132_vm1, %v1222_v49  ;;  %v5863_v48 = vld [vmem:[%s7959_s0 + $0x30] ss:$0 sm:$0xff] }
  0xa8   :  { %v1392_v1 = vpop.permute.xlu0 %1391  ;;  %v1394_v63 = vpop.permute.xlu1 %1393  ;;  %1305 = vmatprep.mubr.f32.mxu0 %v7969_v2  ;;  %1376 = vmatprep.mubr.f32.mxu1 %v7969_v2 }
  0xa9   :  { %v1397_v15 = vsel %vm1395_vm8, %v1390_v56, %v1392_v1  ;;  %v1396_v18 = vsel %vm1395_vm8, %v1392_v1, %v1394_v63  ;;  %v1399_v16 = vsel %vm1395_vm8, %v1394_v63, %v1388_v4 }
  0xaa   :  { %v1417_v0 = vmul.f32 %v6931_v58, %v1397_v15  ;;  %v1419_v19 = vmul.f32 %v6935_v61, %v1399_v16  ;;  %v1418_v25 = vmul.f32 %v6944_v3, %v1396_v18  ;;  %v5854_v15 = vld [vmem:[%s7960_s2 + $0x38] sm:$0xff]  ;;  %v6324_v18 = vld [vmem:[%s7958_s4 + $0x40] sm:$0xff]  }
  0xab   :  { %v6326_v16 = vld [vmem:[%s7958_s4 + $0xc0] sm:$0xff]  }
  0xac   :  { %v1584_v34 = vpop.permute.xlu0 %1583  ;;  %5855 = vmatprep.subr.msk.mxu0 %vm132_vm1, %v1417_v0  ;;  %v1586_v37 = vpop.permute.xlu1 %1585  ;;  %5858 = vmatprep.subr.msk.mxu1 %vm132_vm1, %v1419_v19  ;;  %v5865_v0 = vld [vmem:[%s7960_s2 + $0x40] sm:$0xff] }
  0xad   :  { %v1594_v44 = vsel %vm1591_vm9, %v1584_v34, %v1586_v37  ;;  %v6325_v19 = vld [vmem:[%s7958_s4] sm:$0xff]  }
  0xae   :  { %5850 = vmatmul.mubr.msk.f32.vlgmr.msra.gmra.mrb[0].mxu0 %vm128_vm3, %v5847_v26  ;;  %5853 = vmatmul.mubr.msk.f32.vlgmr.msra.gmra.mrb[0].mxu1 %vm128_vm3, %v5847_v26  ;;  %v1612_v1 = vmul.f32 %v5861_v41, %v1594_v44  ;;  %v6329_v26 = vld [vmem:[%s7958_s4 + $0x8] sm:$0xff]   ;;  %v6334_v41 = vld [vmem:[%s7958_s4 + $0xd0] sm:$0xff]  }
  0xaf   :  { %5856 = vmatpush1.msk.msra.mxu0 %vm132_vm1, %v1416_v20  ;;  %5859 = vmatpush1.msk.msra.mxu1 %vm132_vm1, %v1418_v25  ;;  %v6327_v20 = vld [vmem:[%s7958_s4 + $0x80] sm:$0xff]   ;;  %v6328_v25 = vld [vmem:[%s7958_s4 + $0x48] sm:$0xff]   ;;  %v6335_v44 = vld [vmem:[%s7958_s4 + $0x90] sm:$0xff]  }
  0xb0   :  { %v1588_v45 = vpop.permute.xlu0 %1587  ;;  %v1590_v46 = vpop.permute.xlu1 %1589  ;;  %1501 = vmatprep.mubr.f32.mxu0 %v7969_v2  ;;  %1572 = vmatprep.mubr.f32.mxu1 %v7969_v2 }
  0xb1   :  { %v1593_v49 = vsel %vm1591_vm9, %v1586_v37, %v1588_v45  ;;  %v1592_v50 = vsel %vm1591_vm9, %v1588_v45, %v1590_v46  ;;  %v1595_v4 = vsel %vm1591_vm9, %v1590_v46, %v1584_v34  ;;  %v6330_v34 = vld [vmem:[%s7958_s4 + $0xc8] sm:$0xff]   ;;  %v6336_v45 = vld [vmem:[%s7958_s4 + $0x58] sm:$0xff]  }
  0xb2   :  { %v1613_v56 = vmul.f32 %v5862_v38, %v1593_v49  ;;  %v1615_v17 = vmul.f32 %v5864_v39, %v1595_v4  ;;  %v1614_v63 = vmul.f32 %v5863_v48, %v1592_v50  ;;  %v6331_v37 = vld [vmem:[%s7958_s4 + $0x88] sm:$0xff]   ;;  %v6332_v38 = vld [vmem:[%s7958_s4 + $0x50] sm:$0xff]   ;;  %v6337_v46 = vld [vmem:[%s7958_s4 + $0x18] sm:$0xff]  }
  0xb3   :  { %v6333_v39 = vld [vmem:[%s7958_s4 + $0x10] sm:$0xff]   ;;  %v6338_v48 = vld [vmem:[%s7958_s4 + $0xd8] sm:$0xff]   ;;  %v6340_v50 = vld [vmem:[%s7958_s4 + $0x60] sm:$0xff]  }
  0xb4   :  { %5866 = vmatprep.subr.msk.mxu0 %vm132_vm1, %v1613_v56  ;;  %5869 = vmatprep.subr.msk.mxu1 %vm132_vm1, %v1615_v17  ;;  %v6339_v49 = vld [vmem:[%s7958_s4 + $0x98] sm:$0xff]   ;;  %v6341_v4 = vld [vmem:[%s7958_s4 + $0x20] sm:$0xff]  }
  0xb5   :  { %v6342_v56 = vld [vmem:[%s7958_s4 + $0xe0] sm:$0xff]  }
  0xb6   :  { %5857 = vmatmul.mubr.msk.f32.vlgmr.msra.gmra.mrb[0].mxu0 %vm128_vm3, %v5854_v15  ;;  %5860 = vmatmul.mubr.msk.f32.vlgmr.msra.gmra.mrb[0].mxu1 %vm128_vm3, %v5854_v15  ;;  %v6343_v17 = vld [vmem:[%s7958_s4 + $0xa0] sm:$0xff]   ;;  %v6346_v15 = vld [vmem:[%s7958_s4 + $0xe8] sm:$0xff]  }
  0xb7   :  { %5867 = vmatpush1.msk.msra.mxu0 %vm132_vm1, %v1612_v1  ;;  %5870 = vmatpush1.msk.msra.mxu1 %vm132_vm1, %v1614_v63  ;;  %v6344_v1 = vld [vmem:[%s7958_s4 + $0x68] sm:$0xff]  }
  0xb8   :  { %1697 = vmatprep.mubr.f32.mxu0 %v7969_v2  ;;  %1768 = vmatprep.mubr.f32.mxu1 %v7969_v2  ;;  %v6345_v63 = vld [vmem:[%s7958_s4 + $0x28] sm:$0xff]  }
  0xb9   :  { %6067 = vmatprep.subr.bf16.mxu0 %v6324_v18  ;;  %6089 = vmatprep.subr.bf16.mxu1 %v6326_v16  ;;  %v6347_v18 = vld [vmem:[%s7958_s4 + $0xa8] sm:$0xff]   ;;  %v6348_v16 = vld [vmem:[%s7958_s4 + $0x70] sm:$0xff]  }
  0xbe   :  { %5868 = vmatmul.mubr.msk.f32.vlgmr.msra.gmra.mrb[0].mxu0 %vm128_vm3, %v5865_v0  ;;  %5871 = vmatmul.mubr.msk.f32.vlgmr.msra.gmra.mrb[0].mxu1 %vm128_vm3, %v5865_v0  ;;  %v6349_v0 = vld [vmem:[%s7958_s4 + $0x30] sm:$0xff]  }
  0xbf   :  { %6068 = vmatpush3.bf16.msra.mxu0 %v6325_v19  ;;  %6090 = vmatpush3.bf16.msra.mxu1 %v6327_v20  ;;  %v6350_v19 = vld [vmem:[%s7958_s4 + $0xf0] sm:$0xff]   ;;  %v6352_v20 = vld [vmem:[%s7958_s4 + $0x78] sm:$0xff]  }
  0xc0   :  { %6069 = vmatprep.subr.bf16.mxu0 %v6328_v25  ;;  %6091 = vmatprep.subr.bf16.mxu1 %v6330_v34  ;;  %v6351_v25 = vld [vmem:[%s7958_s4 + $0xb0] sm:$0xff]   ;;  %v6353_v34 = vld [vmem:[%s7958_s4 + $0x38] sm:$0xff]  }
  0xc3   :  { %6070 = vmatpush3.bf16.msra.mxu0 %v6329_v26  ;;  %6092 = vmatpush3.bf16.msra.mxu1 %v6331_v37  ;;  %v6354_v26 = vld [vmem:[%s7958_s4 + $0xf8] sm:$0xff]  }
  0xc4   :  { %6071 = vmatprep.subr.bf16.mxu0 %v6332_v38  ;;  %6093 = vmatprep.subr.bf16.mxu1 %v6334_v41  ;;  %v6355_v37 = vld [vmem:[%s7958_s4 + $0xb8] sm:$0xff]   ;;  %v6356_v38 = vld [vmem:[%s7958_s4 + $0x140] sm:$0xff]   ;;  %v6480_v41 = vmov 1966171168  }
  0xc7   :  { %6072 = vmatpush3.bf16.msra.mxu0 %v6333_v39  ;;  %6094 = vmatpush3.bf16.msra.mxu1 %v6335_v44  ;;  %v6359_v39 = vld [vmem:[%s7958_s4 + $0x1c0] sm:$0xff]   ;;  %v1797_v44 = vunpack.c.l.s4 %v6480_v41 }
  0xc8   :  { %6073 = vmatprep.subr.bf16.mxu0 %v6336_v45  ;;  %6095 = vmatprep.subr.bf16.mxu1 %v6338_v48  ;;  %v1783_v45 = vpop.permute.xlu0 %1782 }
  0xcb   :  { %6074 = vmatpush3.bf16.msra.mxu0 %v6337_v46  ;;  %6096 = vmatpush3.bf16.msra.mxu1 %v6339_v49  ;;  %v1798_v46 = vunpack.c.0.s8 %v1797_v44 }
  0xcc   :  { %6075 = vmatprep.subr.bf16.mxu0 %v6340_v50  ;;  %6097 = vmatprep.subr.bf16.mxu1 %v6342_v56 }
  0xcf   :  { %6076 = vmatpush3.bf16.msra.mxu0 %v6341_v4  ;;  %6098 = vmatpush3.bf16.msra.mxu1 %v6343_v17 }
  0xd0   :  { %6077 = vmatprep.subr.bf16.mxu0 %v6344_v1  ;;  %6099 = vmatprep.subr.bf16.mxu1 %v6346_v15 }
  0xd3   :  { %6078 = vmatpush3.bf16.msra.mxu0 %v6345_v63  ;;  %6100 = vmatpush3.bf16.msra.mxu1 %v6347_v18 }
  0xd4   :  { %6079 = vmatprep.subr.bf16.mxu0 %v6348_v16  ;;  %6101 = vmatprep.subr.bf16.mxu1 %v6350_v19  ;;  %v7112_v16 = vsub.s32 %v1798_v46, %v6629_v6 }
  0xd7   :  { %6080 = vmatpush3.bf16.msra.mxu0 %v6349_v0  ;;  %6102 = vmatpush3.bf16.msra.mxu1 %v6351_v25 }
  0xd8   :  { %6081 = vmatprep.subr.bf16.mxu0 %v6352_v20  ;;  %6103 = vmatprep.subr.bf16.mxu1 %v6354_v26 }
  0xdb   :  { %6082 = vmatpush3.bf16.msra.mxu0 %v6353_v34  ;;  %6104 = vmatpush3.bf16.msra.mxu1 %v6355_v37 }
  0xdc   :  { %6111 = vmatprep.subr.bf16.mxu0 %v6356_v38  ;;  %6133 = vmatprep.subr.bf16.mxu1 %v6359_v39 }
 0x191   :  { %v1699_v48 = vpop.f32.mrb[0].mxu0  ;;  %v1770_v49 = vpop.f32.mrb[0].mxu1 }
 0x192   :  { %v1785_v50 = vadd.f32 %v1783_v45, %v1699_v48  ;;  %v1787_v4 = vadd.f32 %v1783_v45, %v1770_v49  ;;  %v1701_v56 = vpop.f32.mrb[1].mxu0  ;;  %v1772_v17 = vpop.f32.mrb[1].mxu1 }
 0x193   :  { %v1786_v1 = vadd.f32 %v1783_v45, %v1701_v56  ;;  %v1788_v63 = vadd.f32 %v1783_v45, %v1772_v17  ;;  %v6481_v45 = vmov 1983009808  }
 0x194   :  { %v1789_v15 = vmax.f32 %v1785_v50, 0.0  ;;  %v1791_v18 = vmax.f32 %v1787_v4, 0.0  ;;  %v1958_v46 = vunpack.c.l.s4 %v6481_v45 }
 0x195   :  { %v1790_v0 = vmax.f32 %v1786_v1, 0.0  ;;  %v1792_v19 = vmax.f32 %v1788_v63, 0.0 }
 0x197   :  { %v1795_v20 = vcombine.low %v1789_v15, %v1790_v0  ;;  %v1835_v25 = vcombine.high %v1789_v15, %v1790_v0  ;;  %v1874_v26 = vcombine.low %v1791_v18, %v1792_v19  ;;  %v1911_v34 = vcombine.high %v1791_v18, %v1792_v19 }
 0x199   :  { %v1802_v37 = vrot.slane %v1795_v20, %v7112_v16  ;;  %v1842_v38 = vrot.slane %v1835_v25, %v7112_v16  ;;  %v1881_v39 = vrot.slane %v1874_v26, %v7112_v16  ;;  %v1918_v41 = vrot.slane %v1911_v34, %v7112_v16 }
 0x19b   :  { %v1809_v48 = vrot.slane %v1802_v37, %v7112_v16  ;;  %v1816_v49 = vcombine.high %v1802_v37, %v1802_v37  ;;  %v1849_v50 = vrot.slane %v1842_v38, %v7112_v16  ;;  %v1853_v4 = vcombine.high %v1842_v38, %v1842_v38 }
 0x19c   :  { %v1888_v56 = vrot.slane %v1881_v39, %v7112_v16  ;;  %v1892_v17 = vcombine.high %v1881_v39, %v1881_v39  ;;  %v1925_v1 = vrot.slane %v1918_v41, %v7112_v16  ;;  %v1929_v63 = vcombine.high %v1918_v41, %v1918_v41 }
 0x19d   :  { %1815 = vst.msk [vmem:[#allocation2] ss:$2 sm:$0x3] %vm7119_vm10, %v1809_v48  ;;  %v1823_v5 = vrot.slane %v1816_v49, %v7112_v16  ;;  %v1827_v15 = vcombine.high %v1809_v48, %v1809_v48  ;;  %1852 = vst.msk [vmem:[#allocation2 + $0x10] ss:$2 sm:$0x3] %vm7119_vm10, %v1849_v50  ;;  %v1860_v18 = vrot.slane %v1853_v4, %v7112_v16  ;;  %v1959_v41 = vunpack.c.0.s8 %v1958_v46 }
 0x19e   :  { %v1864_v0 = vcombine.high %v1849_v50, %v1849_v50  ;;  %1891 = vst.msk [vmem:[#allocation2 + $0x1] ss:$2 sm:$0x3] %vm7119_vm10, %v1888_v56  ;;  %v1899_v19 = vrot.slane %v1892_v17, %v7112_v16  ;;  %v1903_v20 = vcombine.high %v1888_v56, %v1888_v56  ;;  %1928 = vst.msk [vmem:[#allocation2 + $0x11] ss:$2 sm:$0x3] %vm7119_vm10, %v1925_v1 }
 0x19f   :  { %v1936_v25 = vrot.slane %v1929_v63, %v7112_v16  ;;  %v1940_v26 = vcombine.high %v1925_v1, %v1925_v1  ;;  %1826 = vst.msk [vmem:[#allocation2 + $0x4] ss:$2 sm:$0x3] %vm7119_vm10, %v1823_v5  ;;  %1830 = vst.msk [vmem:[#allocation2 + $0x8] ss:$2 sm:$0x3] %vm7119_vm10, %v1827_v15  ;;  %v1831_v34 = vcombine.high %v1823_v5, %v1823_v5 }
 0x1a0   :  { %1863 = vst.msk [vmem:[#allocation2 + $0x14] ss:$2 sm:$0x3] %vm7119_vm10, %v1860_v18  ;;  %1867 = vst.msk [vmem:[#allocation2 + $0x18] ss:$2 sm:$0x3] %vm7119_vm10, %v1864_v0  ;;  %v1868_v37 = vcombine.high %v1860_v18, %v1860_v18  ;;  %v1907_v38 = vcombine.high %v1899_v19, %v1899_v19  ;;  %v7164_v45 = vsub.s32 %v1959_v41, %v6629_v6 }
 0x1a1   :  { %1902 = vst.msk [vmem:[#allocation2 + $0x5] ss:$2 sm:$0x3] %vm7119_vm10, %v1899_v19  ;;  %1906 = vst.msk [vmem:[#allocation2 + $0x9] ss:$2 sm:$0x3] %vm7119_vm10, %v1903_v20  ;;  %v1944_v39 = vcombine.high %v1936_v25, %v1936_v25 }
 0x1a2   :  { %1939 = vst.msk [vmem:[#allocation2 + $0x15] ss:$2 sm:$0x3] %vm7119_vm10, %v1936_v25  ;;  %1943 = vst.msk [vmem:[#allocation2 + $0x19] ss:$2 sm:$0x3] %vm7119_vm10, %v1940_v26 }
 0x1a3   :  { %1834 = vst.msk [vmem:[#allocation2 + $0xc] ss:$2 sm:$0x3] %vm7119_vm10, %v1831_v34  ;;  %1871 = vst.msk [vmem:[#allocation2 + $0x1c] ss:$2 sm:$0x3] %vm7119_vm10, %v1868_v37 }
 0x1a4   :  { %1910 = vst.msk [vmem:[#allocation2 + $0xd] ss:$2 sm:$0x3] %vm7119_vm10, %v1907_v38  ;;  %1947 = vst.msk [vmem:[#allocation2 + $0x1d] ss:$2 sm:$0x3] %vm7119_vm10, %v1944_v39 }
 0x1a5   :  { %v6357_v5 = vld [vmem:[%s7958_s4 + $0x100] sm:$0xff]   ;;  %v6361_v34 = vld [vmem:[%s7958_s4 + $0x148] sm:$0xff]  }
 0x1a6   :  { %v6360_v26 = vld [vmem:[%s7958_s4 + $0x180] sm:$0xff]   ;;  %v6364_v39 = vld [vmem:[%s7958_s4 + $0x1c8] sm:$0xff]  }
 0x1a7   :  { %v6363_v41 = vld [vmem:[%s7958_s4 + $0x108] sm:$0xff]  }
 0x1a8   :  { %v1948_v48 = vld [vmem:[#allocation2] sm:$0xff] }
 0x1a9   :  { %v1963_v49 = vrot.slane %v1948_v48, %v7164_v45  ;;  %v1956_v50 = vcombine.high %v1948_v48, %v1948_v48 }
 0x1ab   :  { %v1949_v46 = vld [vmem:[#allocation2 + $0x8] sm:$0xff]  ;;  %v1971_v4 = vcombine.high %v1963_v49, %v1963_v49  ;;  %v1970_v56 = vrot.slane %v1956_v50, %v7164_v45  ;;  %v2040_v0 = vpack.c.bf16 %v1963_v49, %v1963_v49  ;;  %v6366_v49 = vld [vmem:[%s7958_s4 + $0x150] sm:$0xff]  }
 0x1ac   :  { %v7169_v17 = vrot.slane %v1949_v46, %v7164_v45  ;;  %v1973_v1 = vcombine.high %v1949_v46, %v1949_v46  ;;  %v6365_v50 = vld [vmem:[%s7958_s4 + $0x188] sm:$0xff]   ;;  %v6368_v46 = vld [vmem:[%s7958_s4 + $0x1d0] sm:$0xff]  }
 0x1ad   :  { %v2041_v63 = vpack.c.bf16 %v1971_v4, %v1971_v4  ;;  %v1972_v15 = vcombine.high %v1970_v56, %v1970_v56  ;;  %v2042_v37 = vpack.c.bf16 %v1970_v56, %v1970_v56  ;;  %v6367_v4 = vld [vmem:[%s7958_s4 + $0x110] sm:$0xff]   ;;  %v6370_v56 = vld [vmem:[%s7958_s4 + $0x158] sm:$0xff]  }
 0x1ae   :  { %v1988_v18 = vcombine.high %v7169_v17, %v7169_v17  ;;  %v7177_v19 = vrot.slane %v1973_v1, %v7164_v45  ;;  %v6369_v1 = vld [vmem:[%s7958_s4 + $0x190] sm:$0xff]  }
 0x1af   :  { %3119 = vmatprep.mubr.bf16.mxu0 %v2041_v63  ;;  %v2043_v20 = vpack.c.bf16 %v1972_v15, %v1972_v15  ;;  %v6372_v63 = vld [vmem:[%s7958_s4 + $0x1d8] sm:$0xff]   ;;  %v6374_v15 = vld [vmem:[%s7958_s4 + $0x160] sm:$0xff]  }
 0x1b0   :  { %v2045_v25 = vpack.c.bf16 %v1988_v18, %v1988_v18  ;;  %3120 = vmatmul.mubr.bf16.vlgmr.msra.gmra.mrb[4].mxu0 %v2040_v0  ;;  %v1989_v38 = vcombine.high %v7177_v19, %v7177_v19  ;;  %v6373_v18 = vld [vmem:[%s7958_s4 + $0x198] sm:$0xff]   ;;  %v6376_v0 = vld [vmem:[%s7958_s4 + $0x1e0] sm:$0xff]  }
 0x1b1   :  { %6112 = vmatpush3.bf16.msra.mxu0 %v6357_v5  ;;  %3159 = vmatprep.mubr.bf16.mxu1 %v2043_v20  ;;  %v6371_v5 = vld [vmem:[%s7958_s4 + $0x118] sm:$0xff]   ;;  %v6375_v20 = vld [vmem:[%s7958_s4 + $0x120] sm:$0xff]  }
 0x1b2   :  { %3199 = vmatprep.mubr.bf16.mxu0 %v2045_v25  ;;  %3160 = vmatmul.mubr.bf16.vlgmr.msra.gmra.mrb[4].mxu1 %v2042_v37  ;;  %v2047_v48 = vpack.c.bf16 %v1989_v38, %v1989_v38  ;;  %v6378_v25 = vld [vmem:[%s7958_s4 + $0x168] sm:$0xff]   ;;  %v6382_v38 = vld [vmem:[%s7958_s4 + $0x170] sm:$0xff]  }
 0x1b3   :  { %6134 = vmatpush3.bf16.msra.mxu1 %v6360_v26  ;;  %6113 = vmatprep.subr.bf16.mxu0 %v6361_v34  ;;  %v6377_v26 = vld [vmem:[%s7958_s4 + $0x1a0] sm:$0xff]   ;;  %v6380_v34 = vld [vmem:[%s7958_s4 + $0x1e8] sm:$0xff]  }
 0x1b4   :  { %3239 = vmatprep.mubr.bf16.mxu1 %v2047_v48  ;;  %6135 = vmatprep.subr.bf16.mxu1 %v6364_v39  ;;  %v6379_v37 = vld [vmem:[%s7958_s4 + $0x128] sm:$0xff]   ;;  %v1950_v39 = vld [vmem:[#allocation2 + $0x10] sm:$0xff] }
 0x1b5   :  { %6114 = vmatpush3.bf16.msra.mxu0 %v6363_v41  ;;  %v6381_v41 = vld [vmem:[%s7958_s4 + $0x1a8] sm:$0xff]   ;;  %v6384_v48 = vld [vmem:[%s7958_s4 + $0x1f0] sm:$0xff]  }
 0x1b6   :  { %6115 = vmatprep.subr.bf16.mxu0 %v6366_v49  ;;  %v6383_v49 = vld [vmem:[%s7958_s4 + $0x130] sm:$0xff]  }
 0x1b7   :  { %6136 = vmatpush3.bf16.msra.mxu1 %v6365_v50  ;;  %v1990_v50 = vcombine.high %v1950_v39, %v1950_v39 }
 0x1b8   :  { %6137 = vmatprep.subr.bf16.mxu1 %v6368_v46  ;;  %v6386_v46 = vld [vmem:[%s7958_s4 + $0x178] sm:$0xff]  }
 0x1b9   :  { %6116 = vmatpush3.bf16.msra.mxu0 %v6367_v4  ;;  %v6385_v4 = vld [vmem:[%s7958_s4 + $0x1b0] sm:$0xff]  }
 0x1ba   :  { %6117 = vmatprep.subr.bf16.mxu0 %v6370_v56  ;;  %v7260_v56 = vrot.slane %v1950_v39, %v7164_v45  ;;  %v6393_v39 = vld [vmem:[%s7958_s4 + $0x280] sm:$0xff]  }
 0x1bb   :  { %6138 = vmatpush3.bf16.msra.mxu1 %v6369_v1  ;;  %v6388_v1 = vld [vmem:[%s7958_s4 + $0x1f8] sm:$0xff]  }
 0x1bc   :  { %6139 = vmatprep.subr.bf16.mxu1 %v6372_v63  ;;  %v6387_v63 = vld [vmem:[%s7958_s4 + $0x138] sm:$0xff]  }
 0x1bd   :  { %6118 = vmatpush3.bf16.msra.mxu0 %v6371_v5  ;;  %v7269_v5 = vrot.slane %v1990_v50, %v7164_v45  ;;  %v6399_v50 = vld [vmem:[%s7958_s4 + $0x250] sm:$0xff]  }
 0x1be   :  { %6119 = vmatprep.subr.bf16.mxu0 %v6374_v15  ;;  %v6390_v15 = vld [vmem:[%s7958_s4 + $0x240] sm:$0xff]  }
 0x1bf   :  { %6140 = vmatpush3.bf16.msra.mxu1 %v6373_v18  ;;  %v6389_v18 = vld [vmem:[%s7958_s4 + $0x1b8] sm:$0xff]  }
 0x1c0   :  { %6141 = vmatprep.subr.bf16.mxu1 %v6376_v0  ;;  %v2005_v0 = vcombine.high %v7260_v56, %v7260_v56 }
 0x1c1   :  { %6120 = vmatpush3.bf16.msra.mxu0 %v6375_v20  ;;  %v6392_v20 = vld [vmem:[%s7958_s4 + $0x2c0] sm:$0xff]  }
 0x1c2   :  { %6121 = vmatprep.subr.bf16.mxu0 %v6378_v25  ;;  %v6391_v25 = vld [vmem:[%s7958_s4 + $0x200] sm:$0xff]  }
 0x1c3   :  { %6142 = vmatpush3.bf16.msra.mxu1 %v6377_v26  ;;  %v2006_v26 = vcombine.high %v7269_v5, %v7269_v5 }
 0x1c4   :  { %6143 = vmatprep.subr.bf16.mxu1 %v6380_v34  ;;  %v2044_v34 = vpack.c.bf16 %v7169_v17, %v7169_v17  ;;  %v6397_v17 = vld [vmem:[%s7958_s4 + $0x2c8] sm:$0xff]  }
 0x1c5   :  { %6122 = vmatpush3.bf16.msra.mxu0 %v6379_v37  ;;  %v6395_v37 = vld [vmem:[%s7958_s4 + $0x248] sm:$0xff]  }
 0x1c6   :  { %6123 = vmatprep.subr.bf16.mxu0 %v6382_v38  ;;  %v2049_v38 = vpack.c.bf16 %v2005_v0, %v2005_v0  ;;  %v6407_v0 = vld [vmem:[%s7958_s4 + $0x260] sm:$0xff]  }
 0x1c7   :  { %6144 = vmatpush3.bf16.msra.mxu1 %v6381_v41  ;;  %v2046_v41 = vpack.c.bf16 %v7177_v19, %v7177_v19  ;;  %v6398_v19 = vld [vmem:[%s7958_s4 + $0x288] sm:$0xff]  }
 0x1c8   :  { %6145 = vmatprep.subr.bf16.mxu1 %v6384_v48  ;;  %v2051_v48 = vpack.c.bf16 %v2006_v26, %v2006_v26  ;;  %v6408_v26 = vld [vmem:[%s7958_s4 + $0x220] sm:$0xff]  }
 0x1c9   :  { %6124 = vmatpush3.bf16.msra.mxu0 %v6383_v49  ;;  %v6396_v49 = vld [vmem:[%s7958_s4 + $0x208] sm:$0xff]  }
 0x1ca   :  { %6125 = vmatprep.subr.bf16.mxu0 %v6386_v46  ;;  %v6401_v46 = vld [vmem:[%s7958_s4 + $0x2d0] sm:$0xff]  }
 0x1cb   :  { %6146 = vmatpush3.bf16.msra.mxu1 %v6385_v4  ;;  %v6400_v4 = vld [vmem:[%s7958_s4 + $0x210] sm:$0xff]  }
 0x1cc   :  { %6147 = vmatprep.subr.bf16.mxu1 %v6388_v1  ;;  %v6403_v1 = vld [vmem:[%s7958_s4 + $0x258] sm:$0xff]  }
 0x1cd   :  { %6126 = vmatpush3.bf16.msra.mxu0 %v6387_v63  ;;  %v6402_v63 = vld [vmem:[%s7958_s4 + $0x290] sm:$0xff]  }
 0x1ce   :  { %6155 = vmatprep.subr.bf16.mxu0 %v6390_v15  ;;  %v6405_v15 = vld [vmem:[%s7958_s4 + $0x2d8] sm:$0xff]  }
 0x1cf   :  { %6148 = vmatpush3.bf16.msra.mxu1 %v6389_v18  ;;  %v6404_v18 = vld [vmem:[%s7958_s4 + $0x218] sm:$0xff]  }
 0x1d0   :  { %3200 = vmatmul.mubr.bf16.vlgmr.msra.gmra.mrb[8].mxu0 %v2044_v34  ;;  %6177 = vmatprep.subr.bf16.mxu1 %v6392_v20  ;;  %v6406_v20 = vld [vmem:[%s7958_s4 + $0x298] sm:$0xff]   ;;  %v6411_v34 = vld [vmem:[%s7958_s4 + $0x268] sm:$0xff]  }
 0x1d1   :  { %6156 = vmatpush3.bf16.msra.mxu0 %v6391_v25  ;;  %3279 = vmatprep.mubr.bf16.mxu0 %v2049_v38  ;;  %v6409_v25 = vld [vmem:[%s7958_s4 + $0x2e0] sm:$0xff]   ;;  %v6413_v38 = vld [vmem:[%s7958_s4 + $0x2e8] sm:$0xff]  }
 0x1d2   :  { %3240 = vmatmul.mubr.bf16.vlgmr.msra.gmra.mrb[8].mxu1 %v2046_v41  ;;  %6157 = vmatprep.subr.bf16.mxu0 %v6395_v37  ;;  %v6410_v37 = vld [vmem:[%s7958_s4 + $0x2a0] sm:$0xff]   ;;  %v6415_v41 = vld [vmem:[%s7958_s4 + $0x270] sm:$0xff]  }
 0x1d3   :  { %6178 = vmatpush3.bf16.msra.mxu1 %v6393_v39  ;;  %3319 = vmatprep.mubr.bf16.mxu1 %v2051_v48  ;;  %v6412_v39 = vld [vmem:[%s7958_s4 + $0x228] sm:$0xff]  }
 0x1d4   :  { %6179 = vmatprep.subr.bf16.mxu1 %v6397_v17  ;;  %v1951_v17 = vld [vmem:[#allocation2 + $0x18] sm:$0xff]  ;;  %v6414_v48 = vld [vmem:[%s7958_s4 + $0x2a8] sm:$0xff]  }
 0x1d5   :  { %6158 = vmatpush3.bf16.msra.mxu0 %v6396_v49  ;;  %v6417_v49 = vld [vmem:[%s7958_s4 + $0x2f0] sm:$0xff]  }
 0x1d6   :  { %6159 = vmatprep.subr.bf16.mxu0 %v6399_v50  ;;  %v6416_v50 = vld [vmem:[%s7958_s4 + $0x230] sm:$0xff]  }
 0x1d7   :  { %6180 = vmatpush3.bf16.msra.mxu1 %v6398_v19  ;;  %v2007_v19 = vcombine.high %v1951_v17, %v1951_v17 }
 0x1d8   :  { %6181 = vmatprep.subr.bf16.mxu1 %v6401_v46  ;;  %v6419_v46 = vld [vmem:[%s7958_s4 + $0x278] sm:$0xff]  }
 0x1d9   :  { %6160 = vmatpush3.bf16.msra.mxu0 %v6400_v4  ;;  %v6418_v4 = vld [vmem:[%s7958_s4 + $0x2b0] sm:$0xff]  }
 0x1da   :  { %6161 = vmatprep.subr.bf16.mxu0 %v6403_v1  ;;  %v7370_v1 = vrot.slane %v1951_v17, %v7164_v45  ;;  %v2050_v17 = vpack.c.bf16 %v7269_v5, %v7269_v5  ;;  %v6431_v5 = vld [vmem:[%s7958_s4 + $0x388] sm:$0xff]  }
 0x1db   :  { %6182 = vmatpush3.bf16.msra.mxu1 %v6402_v63  ;;  %v6421_v63 = vld [vmem:[%s7958_s4 + $0x2f8] sm:$0xff]  }
 0x1dc   :  { %6183 = vmatprep.subr.bf16.mxu1 %v6405_v15  ;;  %v6420_v15 = vld [vmem:[%s7958_s4 + $0x238] sm:$0xff]  }
 0x1dd   :  { %6162 = vmatpush3.bf16.msra.mxu0 %v6404_v18  ;;  %v7379_v18 = vrot.slane %v2007_v19, %v7164_v45  ;;  %v6424_v45 = vld [vmem:[%s7958_s4 + $0x300] sm:$0xff]   ;;  %v6434_v19 = vld [vmem:[%s7958_s4 + $0x3d0] sm:$0xff]  }
 0x1de   :  { %6163 = vmatprep.subr.bf16.mxu0 %v6407_v0  ;;  %v6423_v0 = vld [vmem:[%s7958_s4 + $0x340] sm:$0xff]  }
 0x1df   :  { %6184 = vmatpush3.bf16.msra.mxu1 %v6406_v20  ;;  %v6422_v20 = vld [vmem:[%s7958_s4 + $0x2b8] sm:$0xff]  }
 0x1e0   :  { %6185 = vmatprep.subr.bf16.mxu1 %v6409_v25  ;;  %v2022_v25 = vcombine.high %v7370_v1, %v7370_v1 }
 0x1e1   :  { %6164 = vmatpush3.bf16.msra.mxu0 %v6408_v26  ;;  %v6425_v26 = vld [vmem:[%s7958_s4 + $0x3c0] sm:$0xff]  }
 0x1e2   :  { %6165 = vmatprep.subr.bf16.mxu0 %v6411_v34  ;;  %v2023_v34 = vcombine.high %v7379_v18, %v7379_v18 }
 0x1e3   :  { %6186 = vmatpush3.bf16.msra.mxu1 %v6410_v37  ;;  %v2048_v37 = vpack.c.bf16 %v7260_v56, %v7260_v56  ;;  %v6430_v56 = vld [vmem:[%s7958_s4 + $0x3c8] sm:$0xff]  }
 0x1e4   :  { %6187 = vmatprep.subr.bf16.mxu1 %v6413_v38  ;;  %v6428_v38 = vld [vmem:[%s7958_s4 + $0x348] sm:$0xff]  }
 0x1e5   :  { %6166 = vmatpush3.bf16.msra.mxu0 %v6412_v39  ;;  %v2053_v39 = vpack.c.bf16 %v2022_v25, %v2022_v25  ;;  %v6439_v25 = vld [vmem:[%s7958_s4 + $0x398] sm:$0xff]  }
 0x1e6   :  { %6167 = vmatprep.subr.bf16.mxu0 %v6415_v41  ;;  %v6426_v41 = vld [vmem:[%s7958_s4 + $0x380] sm:$0xff]  }
 0x1e7   :  { %6188 = vmatpush3.bf16.msra.mxu1 %v6414_v48  ;;  %v2055_v48 = vpack.c.bf16 %v2023_v34, %v2023_v34  ;;  %v6444_v34 = vld [vmem:[%s7958_s4 + $0x368] sm:$0xff]  }
 0x1e8   :  { %6189 = vmatprep.subr.bf16.mxu1 %v6417_v49  ;;  %v6429_v49 = vld [vmem:[%s7958_s4 + $0x308] sm:$0xff]  }
 0x1e9   :  { %6168 = vmatpush3.bf16.msra.mxu0 %v6416_v50  ;;  %v6432_v50 = vld [vmem:[%s7958_s4 + $0x350] sm:$0xff]  }
 0x1ea   :  { %6169 = vmatprep.subr.bf16.mxu0 %v6419_v46  ;;  %v6433_v46 = vld [vmem:[%s7958_s4 + $0x310] sm:$0xff]  }
 0x1eb   :  { %6190 = vmatpush3.bf16.msra.mxu1 %v6418_v4  ;;  %v6436_v4 = vld [vmem:[%s7958_s4 + $0x358] sm:$0xff]  }
 0x1ec   :  { %6191 = vmatprep.subr.bf16.mxu1 %v6421_v63  ;;  %v6435_v63 = vld [vmem:[%s7958_s4 + $0x390] sm:$0xff]  }
 0x1ed   :  { %6170 = vmatpush3.bf16.msra.mxu0 %v6420_v15  ;;  %v6438_v15 = vld [vmem:[%s7958_s4 + $0x3d8] sm:$0xff]  }
 0x1ee   :  { %6199 = vmatprep.subr.bf16.mxu0 %v6423_v0  ;;  %v6437_v0 = vld [vmem:[%s7958_s4 + $0x318] sm:$0xff]  }
 0x1ef   :  { %6192 = vmatpush3.bf16.msra.mxu1 %v6422_v20  ;;  %v6440_v20 = vld [vmem:[%s7958_s4 + $0x360] sm:$0xff]  }
 0x1f0   :  { %3280 = vmatmul.mubr.bf16.vlgmr.msra.gmra.mrb[12].mxu0 %v2048_v37  ;;  %6221 = vmatprep.subr.bf16.mxu1 %v6425_v26  ;;  %v6442_v26 = vld [vmem:[%s7958_s4 + $0x3e0] sm:$0xff]  }
 0x1f1   :  { %6200 = vmatpush3.bf16.msra.mxu0 %v6424_v45  ;;  %3359 = vmatprep.mubr.bf16.mxu0 %v2053_v39  ;;  %v6441_v45 = vld [vmem:[%s7958_s4 + $0x320] sm:$0xff]   ;;  %v6445_v39 = vld [vmem:[%s7958_s4 + $0x328] sm:$0xff]  }
 0x1f2   :  { %3320 = vmatmul.mubr.bf16.vlgmr.msra.gmra.mrb[12].mxu1 %v2050_v17  ;;  %6201 = vmatprep.subr.bf16.mxu0 %v6428_v38  ;;  %v6443_v37 = vld [vmem:[%s7958_s4 + $0x3a0] sm:$0xff]   ;;  %v6446_v38 = vld [vmem:[%s7958_s4 + $0x3e8] sm:$0xff]  }
 0x1f3   :  { %6222 = vmatpush3.bf16.msra.mxu1 %v6426_v41  ;;  %3399 = vmatprep.mubr.bf16.mxu1 %v2055_v48  ;;  %v6448_v41 = vld [vmem:[%s7958_s4 + $0x370] sm:$0xff]   ;;  %v6447_v17 = vld [vmem:[%s7958_s4 + $0x3a8] sm:$0xff]  }
 0x1f4   :  { %6223 = vmatprep.subr.bf16.mxu1 %v6430_v56  ;;  %v6450_v56 = vld [vmem:[%s7958_s4 + $0x3f0] sm:$0xff]  }
 0x1f5   :  { %6202 = vmatpush3.bf16.msra.mxu0 %v6429_v49  ;;  %v6449_v48 = vld [vmem:[%s7958_s4 + $0x330] sm:$0xff]   ;;  %v6452_v49 = vld [vmem:[%s7958_s4 + $0x378] sm:$0xff]  }
 0x1f6   :  { %6203 = vmatprep.subr.bf16.mxu0 %v6432_v50  ;;  %v6451_v50 = vld [vmem:[%s7958_s4 + $0x3b0] sm:$0xff]  }
 0x1f7   :  { %6224 = vmatpush3.bf16.msra.mxu1 %v6431_v5  ;;  %v6454_v5 = vld [vmem:[%s7958_s4 + $0x3f8] sm:$0xff]  }
 0x1f8   :  { %6225 = vmatprep.subr.bf16.mxu1 %v6434_v19  ;;  %v6453_v19 = vld [vmem:[%s7958_s4 + $0x338] sm:$0xff]  }
 0x1f9   :  { %6204 = vmatpush3.bf16.msra.mxu0 %v6433_v46  ;;  %v6455_v46 = vld [vmem:[%s7958_s4 + $0x3b8] sm:$0xff]  }
 0x1fa   :  { %6205 = vmatprep.subr.bf16.mxu0 %v6436_v4  ;;  %v2052_v4 = vpack.c.bf16 %v7370_v1, %v7370_v1  ;;  %v3421_v1 = vld [vmem:[%s7961_s7 + $0x8] sm:$0xff] }
 0x1fb   :  { %6226 = vmatpush3.bf16.msra.mxu1 %v6435_v63  ;;  %v2054_v63 = vpack.c.bf16 %v7379_v18, %v7379_v18  ;;  %v3429_v18 = vld [vmem:[%s7961_s7 + $0x48] sm:$0xff] }
 0x1fc   :  { %6227 = vmatprep.subr.bf16.mxu1 %v6438_v15  ;;  %v3420_v15 = vld [vmem:[%s7961_s7] sm:$0xff] }
 0x1fd   :  { %6206 = vmatpush3.bf16.msra.mxu0 %v6437_v0  ;;  %v3428_v0 = vld [vmem:[%s7961_s7 + $0x40] sm:$0xff] }
 0x1fe   :  { %6207 = vmatprep.subr.bf16.mxu0 %v6440_v20  ;;  %v6001_v20 = vcombine.low %v3420_v15, %v3428_v0 }
 0x1ff   :  { %6228 = vmatpush3.bf16.msra.mxu1 %v6439_v25  ;;  %v6002_v25 = vcombine.high %v3420_v15, %v3428_v0 }
 0x200   :  { %6229 = vmatprep.subr.bf16.mxu1 %v6442_v26  ;;  %v6003_v26 = vcombine.low %v3421_v1, %v3429_v18 }
 0x201   :  { %6208 = vmatpush3.bf16.msra.mxu0 %v6441_v45  ;;  %v6004_v45 = vcombine.high %v3421_v1, %v3429_v18 }
 0x202   :  { %6209 = vmatprep.subr.bf16.mxu0 %v6444_v34 }
 0x203   :  { %6230 = vmatpush3.bf16.msra.mxu1 %v6443_v37  ;;  %v5872_v37 = vld [vmem:[%s7962_s5] ss:$0 sm:$0xff] }
 0x204   :  { %6231 = vmatprep.subr.bf16.mxu1 %v6446_v38 }
 0x205   :  { %6210 = vmatpush3.bf16.msra.mxu0 %v6445_v39 }
 0x206   :  { %6211 = vmatprep.subr.bf16.mxu0 %v6448_v41 }
 0x207   :  { %6232 = vmatpush3.bf16.msra.mxu1 %v6447_v17 }
 0x208   :  { %6233 = vmatprep.subr.bf16.mxu1 %v6450_v56 }
 0x209   :  { %6212 = vmatpush3.bf16.msra.mxu0 %v6449_v48 }
 0x20a   :  { %6213 = vmatprep.subr.bf16.mxu0 %v6452_v49 }
 0x20b   :  { %6234 = vmatpush3.bf16.msra.mxu1 %v6451_v50 }
 0x20c   :  { %6235 = vmatprep.subr.bf16.mxu1 %v6454_v5 }
 0x20d   :  { %6214 = vmatpush3.bf16.msra.mxu0 %v6453_v19 }
 0x20e   :  { %3700 = vmatprep.subr.bf16.mxu0 %v6002_v25 }
 0x20f   :  { %6236 = vmatpush3.bf16.msra.mxu1 %v6455_v46 }
 0x210   :  { %3360 = vmatmul.mubr.bf16.vlgmr.msra.gmra.mrb[16].mxu0 %v2052_v4  ;;  %3741 = vmatprep.subr.bf16.mxu1 %v6004_v45 }
 0x211   :  { %3732 = vmatprep.mubr.bf16.mxu0 %v6479_v7  ;;  %3701 = vmatpush1.bf16.msra.mxu0 %v6001_v20 }
 0x212   :  { %3400 = vmatmul.mubr.bf16.vlgmr.msra.gmra.mrb[16].mxu1 %v2054_v63 }
 0x213   :  { %3773 = vmatprep.mubr.bf16.mxu1 %v6479_v7  ;;  %3742 = vmatpush1.bf16.msra.mxu1 %v6003_v26 }
 0x283   :  { %v6083_v34 = vpop.f32.mrb[4].mxu0 }
 0x284   :  { %v6084_v38 = vpop.f32.mrb[5].mxu0 }
 0x285   :  { %v6085_v39 = vadd.f32 %v6084_v38, %v6083_v34  ;;  %v6086_v41 = vpop.f32.mrb[6].mxu0  ;;  %v6105_v17 = vpop.f32.mrb[4].mxu1 }
 0x286   :  { %v6087_v56 = vpop.f32.mrb[7].mxu0  ;;  %v6106_v48 = vpop.f32.mrb[5].mxu1 }
 0x287   :  { %v3122_v49 = vadd.f32 %v6085_v39, %v5872_v37  ;;  %v6107_v50 = vadd.f32 %v6106_v48, %v6105_v17  ;;  %v6108_v5 = vpop.f32.mrb[6].mxu1 }
 0x288   :  { %v6109_v19 = vpop.f32.mrb[7].mxu1 }
 0x289   :  { %v3162_v46 = vadd.f32 %v6107_v50, %v3122_v49 }
 0x2a3   :  { %v6127_v4 = vpop.f32.mrb[8].mxu0 }
 0x2a4   :  { %v6128_v63 = vpop.f32.mrb[9].mxu0 }
 0x2a5   :  { %v6129_v15 = vadd.f32 %v6128_v63, %v6127_v4  ;;  %v6130_v0 = vpop.f32.mrb[10].mxu0  ;;  %v6149_v1 = vpop.f32.mrb[8].mxu1 }
 0x2a6   :  { %v6131_v20 = vpop.f32.mrb[11].mxu0  ;;  %v6150_v25 = vpop.f32.mrb[9].mxu1 }
 0x2a7   :  { %v3202_v18 = vadd.f32 %v6129_v15, %v3162_v46  ;;  %v6151_v26 = vadd.f32 %v6150_v25, %v6149_v1  ;;  %v6152_v45 = vpop.f32.mrb[10].mxu1 }
 0x2a8   :  { %v6153_v34 = vpop.f32.mrb[11].mxu1 }
 0x2a9   :  { %v3242_v38 = vadd.f32 %v6151_v26, %v3202_v18 }
 0x2c3   :  { %v6171_v41 = vpop.f32.mrb[12].mxu0 }
 0x2c4   :  { %v6172_v56 = vpop.f32.mrb[13].mxu0 }
 0x2c5   :  { %v6173_v2 = vadd.f32 %v6172_v56, %v6171_v41  ;;  %v6174_v37 = vpop.f32.mrb[14].mxu0  ;;  %v6193_v39 = vpop.f32.mrb[12].mxu1  ;;  %v3436_v56 = vld [vmem:[%s7961_s7 + $0x80] sm:$0xff] }
 0x2c6   :  { %v6175_v17 = vpop.f32.mrb[15].mxu0  ;;  %v6194_v48 = vpop.f32.mrb[13].mxu1  ;;  %v3444_v37 = vld [vmem:[%s7961_s7 + $0xc0] sm:$0xff] }
 0x2c7   :  { %v3282_v49 = vadd.f32 %v6173_v2, %v3242_v38  ;;  %v6195_v50 = vadd.f32 %v6194_v48, %v6193_v39  ;;  %v6196_v5 = vpop.f32.mrb[14].mxu1  ;;  %v3437_v39 = vld [vmem:[%s7961_s7 + $0x88] sm:$0xff]  ;;  %v6017_v17 = vcombine.low %v3436_v56, %v3444_v37  ;;  %v6018_v48 = vcombine.high %v3436_v56, %v3444_v37  ;;  %v3447_v56 = vld [vmem:[%s7961_s7 + $0xd8] sm:$0xff] }
 0x2c8   :  { %v6197_v19 = vpop.f32.mrb[15].mxu1 }
 0x2c9   :  { %v3322_v4 = vadd.f32 %v6195_v50, %v3282_v49  ;;  %v3445_v49 = vld [vmem:[%s7961_s7 + $0xc8] sm:$0xff]  ;;  %3702 = vmatprep.subr.bf16.mxu0 %v6018_v48  ;;  %v3422_v19 = vld [vmem:[%s7961_s7 + $0x10] sm:$0xff] }
 0x2ca   :  { %v6019_v50 = vcombine.low %v3437_v39, %v3445_v49  ;;  %v6020_v5 = vcombine.high %v3437_v39, %v3445_v49  ;;  %3703 = vmatpush1.bf16.msra.mxu0 %v6017_v17  ;;  %v3424_v49 = vld [vmem:[%s7961_s7 + $0x20] sm:$0xff] }
 0x2cc   :  { %3743 = vmatprep.subr.bf16.mxu1 %v6020_v5  ;;  %v3425_v5 = vld [vmem:[%s7961_s7 + $0x28] sm:$0xff] }
 0x2cd   :  { %3744 = vmatpush1.bf16.msra.mxu1 %v6019_v50  ;;  %v3432_v50 = vld [vmem:[%s7961_s7 + $0x60] sm:$0xff] }
 0x2e3   :  { %v6215_v63 = vpop.f32.mrb[16].mxu0 }
 0x2e4   :  { %v6216_v0 = vpop.f32.mrb[17].mxu0 }
 0x2e5   :  { %v6217_v20 = vadd.f32 %v6216_v0, %v6215_v63  ;;  %v6218_v46 = vpop.f32.mrb[18].mxu0  ;;  %v6237_v15 = vpop.f32.mrb[16].mxu1  ;;  %v3423_v63 = vld [vmem:[%s7961_s7 + $0x18] sm:$0xff] }
 0x2e6   :  { %v6219_v1 = vpop.f32.mrb[19].mxu0  ;;  %v6238_v25 = vpop.f32.mrb[17].mxu1  ;;  %v3431_v46 = vld [vmem:[%s7961_s7 + $0x58] sm:$0xff] }
 0x2e7   :  { %v3362_v18 = vadd.f32 %v6217_v20, %v3322_v4  ;;  %v6239_v26 = vadd.f32 %v6238_v25, %v6237_v15  ;;  %v6240_v45 = vpop.f32.mrb[18].mxu1  ;;  %v3430_v4 = vld [vmem:[%s7961_s7 + $0x50] sm:$0xff]  ;;  %v6007_v15 = vcombine.low %v3423_v63, %v3431_v46  ;;  %v6008_v1 = vcombine.high %v3423_v63, %v3431_v46  ;;  %v3440_v46 = vld [vmem:[%s7961_s7 + $0xa0] sm:$0xff] }
 0x2e8   :  { %v6241_v34 = vpop.f32.mrb[19].mxu1  ;;  %v6005_v0 = vcombine.low %v3422_v19, %v3430_v4  ;;  %v6006_v20 = vcombine.high %v3422_v19, %v3430_v4  ;;  %v6010_v63 = vcombine.high %v3424_v49, %v3432_v50 }
 0x2e9   :  { %v3402_v41 = vadd.f32 %v6239_v26, %v3362_v18  ;;  %3823 = vmatprep.subr.bf16.mxu1 %v6008_v1  ;;  %v3409_v18 = vld [vmem:[%s7964_s6] sm:$0x3]  ;;  %v3438_v34 = vld [vmem:[%s7961_s7 + $0x90] sm:$0xff] }
 0x2ea   :  { %3782 = vmatprep.subr.bf16.mxu0 %v6006_v20  ;;  %v3448_v1 = vld [vmem:[%s7961_s7 + $0xe0] sm:$0xff] }
 0x2eb   :  { %3408 = vst.msk [vmem:[%s7963_s12] sm:$0x3] %vm3407_vm11, %v3402_v41  ;;  %v3410_v2 = vmul.f32 0.5, %v3402_v41 }
 0x2ed   :  { %v3411_v38 = vmul.f32 1.442695, %v3410_v2  ;;  %v3446_v2 = vld [vmem:[%s7961_s7 + $0xd0] sm:$0xff] }
 0x2ee   :  { %v6022_v17 = vcombine.high %v3438_v34, %v3446_v2  ;;  %v6021_v19 = vcombine.low %v3438_v34, %v3446_v2  ;;  %v3426_v34 = vld [vmem:[%s7961_s7 + $0x30] sm:$0xff] }
 0x2ef   :  { %6456 = vpow2.f32 %v3411_v38  ;;  %v3439_v38 = vld [vmem:[%s7961_s7 + $0x98] sm:$0xff]  ;;  %v3434_v2 = vld [vmem:[%s7961_s7 + $0x70] sm:$0xff] }
 0x2f0   :  { %v6024_v48 = vcombine.high %v3439_v38, %v3447_v56  ;;  %v6023_v4 = vcombine.low %v3439_v38, %v3447_v56  ;;  %v3427_v38 = vld [vmem:[%s7961_s7 + $0x38] sm:$0xff] }
 0x2f1   :  { %v3435_v56 = vld [vmem:[%s7961_s7 + $0x78] sm:$0xff] }
 0x2f9   :  { %v6457_v25 = vpop.eup %6456 }
 0x2fa   :  { %3414 = vrot.lane.b32.xlu1 %v6457_v25, %s6482_s19  ;;  %v6009_v25 = vcombine.low %v3424_v49, %v3432_v50  ;;  %v6016_v49 = vcombine.high %v3427_v38, %v3435_v56  ;;  %v3442_v50 = vld [vmem:[%s7961_s7 + $0xb0] sm:$0xff] }
 0x36c   :  { %v3415_v26 = vpop.permute.xlu1 %3414 }
 0x36d   :  { %v3417_v45 = vmul.f32 %v3415_v26, %v3409_v18  ;;  %v6026_v26 = vcombine.high %v3440_v46, %v3448_v1 }
 0x36f   :  { %v3418_v37 = vadd.f32 %v3417_v45, %v3402_v41  ;;  %v3433_v41 = vld [vmem:[%s7961_s7 + $0x68] sm:$0xff] }
 0x370   :  { %v6012_v20 = vcombine.high %v3425_v5, %v3433_v41  ;;  %v6011_v18 = vcombine.low %v3425_v5, %v3433_v41  ;;  %v3450_v5 = vld [vmem:[%s7961_s7 + $0xf0] sm:$0xff]  ;;  %v3443_v41 = vld [vmem:[%s7961_s7 + $0xb8] sm:$0xff] }
 0x371   :  { %v7551_v39 = vpack.c.bf16 %v3418_v37, %v3418_v37  ;;  %v6025_v37 = vcombine.low %v3440_v46, %v3448_v1  ;;  %v6029_v1 = vcombine.low %v3442_v50, %v3450_v5 }
 0x373   :  { %6033 = vmatmul.mubr.msk.bf16.vlgmr.msra.gmra.mrb[20].mxu0 %vm3696_vm12, %v7551_v39  ;;  %6034 = vmatmul.mubr.msk.bf16.vlgmr.msra.gmra.mrb[20].mxu1 %vm3696_vm12, %v7551_v39 }
 0x374   :  { %3783 = vmatpush1.bf16.msra.mxu0 %v6005_v0  ;;  %3824 = vmatpush1.bf16.msra.mxu1 %v6007_v15  ;;  %v3441_v0 = vld [vmem:[%s7961_s7 + $0xa8] sm:$0xff] }
 0x375   :  { %3784 = vmatprep.subr.bf16.mxu0 %v6022_v17  ;;  %3825 = vmatprep.subr.bf16.mxu1 %v6024_v48  ;;  %v3449_v15 = vld [vmem:[%s7961_s7 + $0xe8] sm:$0xff]  ;;  %v6014_v48 = vcombine.high %v3426_v34, %v3434_v2 }
 0x376   :  { %3814 = vmatprep.mubr.bf16.mxu0 %v6479_v7  ;;  %3855 = vmatprep.mubr.bf16.mxu1 %v6479_v7  ;;  %v6028_v45 = vcombine.high %v3441_v0, %v3449_v15  ;;  %v6027_v17 = vcombine.low %v3441_v0, %v3449_v15  ;;  %v7973_v15 = vmov 0.0  }
 0x378   :  { %3785 = vmatpush1.bf16.msra.mxu0 %v6021_v19  ;;  %3826 = vmatpush1.bf16.msra.mxu1 %v6023_v4  ;;  %v3451_v19 = vld [vmem:[%s7961_s7 + $0xf8] sm:$0xff]  ;;  %v6013_v4 = vcombine.low %v3426_v34, %v3434_v2 }
 0x379   :  { %3864 = vmatprep.subr.bf16.mxu0 %v6010_v63  ;;  %3905 = vmatprep.subr.bf16.mxu1 %v6012_v20  ;;  %v6015_v63 = vcombine.low %v3427_v38, %v3435_v56  ;;  %v6030_v20 = vcombine.high %v3442_v50, %v3450_v5  ;;  %v6032_v46 = vcombine.high %v3443_v41, %v3451_v19 }
 0x37a   :  { %v6031_v0 = vcombine.low %v3443_v41, %v3451_v19 }
 0x37b   :  { %6035 = vmatmul.mubr.msk.bf16.vlgmr.msra.gmra.mrb[24].mxu0 %vm3696_vm12, %v7551_v39  ;;  %6036 = vmatmul.mubr.msk.bf16.vlgmr.msra.gmra.mrb[24].mxu1 %vm3696_vm12, %v7551_v39 }
 0x37c   :  { %3865 = vmatpush1.bf16.msra.mxu0 %v6009_v25  ;;  %3906 = vmatpush1.bf16.msra.mxu1 %v6011_v18  ;;  %v3452_v25 = vld [vmem:[%s7965_s8] sm:$0xff] }
 0x37d   :  { %3866 = vmatprep.subr.bf16.mxu0 %v6026_v26  ;;  %3907 = vmatprep.subr.bf16.mxu1 %v6028_v45  ;;  %v3459_v18 = vrot.slane %v3452_v25, %v6647_v11  ;;  %v3463_v26 = vrot.slane %v3452_v25, %v6644_v10  ;;  %v3471_v45 = vrot.slane %v3452_v25, %v6653_v13 }
 0x37e   :  { %3896 = vmatprep.mubr.bf16.mxu0 %v6479_v7  ;;  %3937 = vmatprep.mubr.bf16.mxu1 %v6479_v7 }
 0x380   :  { %3867 = vmatpush1.bf16.msra.mxu0 %v6025_v37  ;;  %3908 = vmatpush1.bf16.msra.mxu1 %v6027_v17  ;;  %v3474_v17 = vsub.s32 4, %v6629_v6 }
 0x381   :  { %3946 = vmatprep.subr.bf16.mxu0 %v6014_v48  ;;  %3987 = vmatprep.subr.bf16.mxu1 %v6016_v49 }
 0x383   :  { %6037 = vmatmul.mubr.msk.bf16.vlgmr.msra.gmra.mrb[28].mxu0 %vm3696_vm12, %v7551_v39  ;;  %6038 = vmatmul.mubr.msk.bf16.vlgmr.msra.gmra.mrb[28].mxu1 %vm3696_vm12, %v7551_v39 }
 0x384   :  { %3947 = vmatpush1.bf16.msra.mxu0 %v6013_v4  ;;  %3988 = vmatpush1.bf16.msra.mxu1 %v6015_v63 }
 0x385   :  { %3948 = vmatprep.subr.bf16.mxu0 %v6030_v20  ;;  %3989 = vmatprep.subr.bf16.mxu1 %v6032_v46  ;;  %v3475_v20 = vrot.slane %v3452_v25, %v3474_v17  ;;  %v3483_v46 = vrot.slane %v3452_v25, %v6874_v8 }
 0x386   :  { %3978 = vmatprep.mubr.bf16.mxu0 %v6479_v7  ;;  %4019 = vmatprep.mubr.bf16.mxu1 %v6479_v7  ;;  %v3467_v7 = vrot.slane %v3452_v25, %v6650_v12 }
 0x388   :  { %3949 = vmatpush1.bf16.msra.mxu0 %v6029_v1  ;;  %3990 = vmatpush1.bf16.msra.mxu1 %v6031_v0 }
 0x38b   :  { %6039 = vmatmul.mubr.msk.bf16.vlgmr.msra.gmra.mrb[32].mxu0 %vm3696_vm12, %v7551_v39  ;;  %6040 = vmatmul.mubr.msk.bf16.vlgmr.msra.gmra.mrb[32].mxu1 %vm3696_vm12, %v7551_v39 }
 0x38c   :  { %4398 = vmatprep.mubr.f32.mxu0 %v7973_v15  ;;  %4469 = vmatprep.mubr.f32.mxu1 %v7973_v15 }
 0x446   :  { %v3734_v34 = vpop.f32.mrb[20].mxu0  ;;  %v3775_v2 = vpop.f32.mrb[20].mxu1 }
 0x447   :  { %v3735_v38 = vadd.f32 %v3734_v34, %v3459_v18  ;;  %v3776_v39 = vadd.f32 %v3775_v2, %v3467_v7  ;;  %v3736_v56 = vpop.f32.mrb[21].mxu0  ;;  %v3777_v37 = vpop.f32.mrb[21].mxu1  ;;  %v3479_v18 = vrot.slane %v3452_v25, %v6656_v14  ;;  %v3487_v7 = vrot.slane %v3452_v25, %v6917_v47 }
 0x448   :  { %v3737_v48 = vadd.f32 %v3736_v56, %v3463_v26  ;;  %v3778_v49 = vadd.f32 %v3777_v37, %v3471_v45  ;;  %v3738_v50 = vpop.f32.mrb[22].mxu0  ;;  %v3779_v5 = vpop.f32.mrb[22].mxu1 }
 0x449   :  { %v3739_v41 = vpop.f32.mrb[23].mxu0  ;;  %v3780_v19 = vpop.f32.mrb[23].mxu1 }
 0x44a   :  { %v4030_v4 = vcombine.low %v3735_v38, %v3737_v48  ;;  %v4062_v63 = vcombine.low %v3776_v39, %v3778_v49 }
 0x44c   :  { %v4037_v1 = vrot.slane %v4030_v4, %v7112_v16  ;;  %v4069_v0 = vrot.slane %v4062_v63, %v7112_v16  ;;  %v3453_v63 = vld [vmem:[%s7965_s8 + $0x8] sm:$0xff] }
 0x44e   :  { %v4044_v26 = vrot.slane %v4037_v1, %v7112_v16  ;;  %v4048_v45 = vcombine.high %v4037_v1, %v4037_v1  ;;  %v4076_v34 = vrot.slane %v4069_v0, %v7112_v16  ;;  %v4081_v2 = vcombine.high %v4069_v0, %v4069_v0  ;;  %v3816_v38 = vpop.f32.mrb[24].mxu0  ;;  %v3857_v39 = vpop.f32.mrb[24].mxu1 }
 0x44f   :  { %v3817_v56 = vadd.f32 %v3816_v38, %v3475_v20  ;;  %v3858_v37 = vadd.f32 %v3857_v39, %v3483_v46  ;;  %v3818_v48 = vpop.f32.mrb[25].mxu0  ;;  %v3859_v49 = vpop.f32.mrb[25].mxu1 }
 0x450   :  { %4046 = vst.msk [vmem:[#allocation3] ss:$8 sm:$0x3] %vm7119_vm10, %v4044_v26  ;;  %v4055_v50 = vrot.slane %v4048_v45, %v7112_v16  ;;  %4079 = vst.msk [vmem:[#allocation3 + $0x1] ss:$8 sm:$0x3] %vm7119_vm10, %v4076_v34  ;;  %v4088_v25 = vrot.slane %v4081_v2, %v7112_v16  ;;  %v3819_v5 = vadd.f32 %v3818_v48, %v3479_v18 }
 0x451   :  { %v3860_v41 = vadd.f32 %v3859_v49, %v3487_v7  ;;  %v3820_v19 = vpop.f32.mrb[26].mxu0  ;;  %v3861_v4 = vpop.f32.mrb[26].mxu1  ;;  %v3491_v26 = vrot.slane %v3453_v63, %v6647_v11  ;;  %v3499_v18 = vrot.slane %v3453_v63, %v6650_v12  ;;  %v3495_v34 = vrot.slane %v3453_v63, %v6644_v10 }
 0x452   :  { %v3821_v20 = vpop.f32.mrb[27].mxu0  ;;  %v3862_v46 = vpop.f32.mrb[27].mxu1  ;;  %4058 = vst.msk [vmem:[#allocation3 + $0x10] ss:$8 sm:$0x3] %vm7119_vm10, %v4055_v50  ;;  %v4095_v1 = vcombine.low %v3817_v56, %v3819_v5  ;;  %v3503_v2 = vrot.slane %v3453_v63, %v6653_v13 }
 0x453   :  { %4091 = vst.msk [vmem:[#allocation3 + $0x11] ss:$8 sm:$0x3] %vm7119_vm10, %v4088_v25  ;;  %v4128_v0 = vcombine.low %v3858_v37, %v3860_v41 }
 0x454   :  { %v4102_v7 = vrot.slane %v4095_v1, %v7112_v16 }
 0x455   :  { %v4135_v45 = vrot.slane %v4128_v0, %v7112_v16 }
 0x456   :  { %v4109_v38 = vrot.slane %v4102_v7, %v7112_v16  ;;  %v4114_v39 = vcombine.high %v4102_v7, %v4102_v7  ;;  %v3898_v56 = vpop.f32.mrb[28].mxu0  ;;  %v3939_v37 = vpop.f32.mrb[28].mxu1 }
 0x457   :  { %v4142_v48 = vrot.slane %v4135_v45, %v7112_v16  ;;  %v4147_v49 = vcombine.high %v4135_v45, %v4135_v45  ;;  %v3899_v50 = vadd.f32 %v3898_v56, %v3491_v26  ;;  %v3940_v11 = vadd.f32 %v3939_v37, %v3499_v18  ;;  %v3900_v25 = vpop.f32.mrb[29].mxu0  ;;  %v3941_v12 = vpop.f32.mrb[29].mxu1 }
 0x458   :  { %4112 = vst.msk [vmem:[#allocation3 + $0x2] ss:$8 sm:$0x3] %vm7119_vm10, %v4109_v38  ;;  %v4121_v5 = vrot.slane %v4114_v39, %v7112_v16  ;;  %v3901_v13 = vadd.f32 %v3900_v25, %v3495_v34  ;;  %v3942_v41 = vadd.f32 %v3941_v12, %v3503_v2  ;;  %v3902_v19 = vpop.f32.mrb[30].mxu0  ;;  %v3943_v4 = vpop.f32.mrb[30].mxu1  ;;  %v3507_v26 = vrot.slane %v3453_v63, %v3474_v17 }
 0x459   :  { %4145 = vst.msk [vmem:[#allocation3 + $0x3] ss:$8 sm:$0x3] %vm7119_vm10, %v4142_v48  ;;  %v4154_v10 = vrot.slane %v4147_v49, %v7112_v16  ;;  %v3903_v20 = vpop.f32.mrb[31].mxu0  ;;  %v3944_v46 = vpop.f32.mrb[31].mxu1  ;;  %v3515_v18 = vrot.slane %v3453_v63, %v6874_v8  ;;  %v3511_v34 = vrot.slane %v3453_v63, %v6656_v14  ;;  %v3519_v2 = vrot.slane %v3453_v63, %v6917_v47 }
 0x45a   :  { %4124 = vst.msk [vmem:[#allocation3 + $0x12] ss:$8 sm:$0x3] %vm7119_vm10, %v4121_v5  ;;  %v4161_v1 = vcombine.low %v3899_v50, %v3901_v13  ;;  %v4194_v0 = vcombine.low %v3940_v11, %v3942_v41 }
 0x45b   :  { %4157 = vst.msk [vmem:[#allocation3 + $0x13] ss:$8 sm:$0x3] %vm7119_vm10, %v4154_v10 }
 0x45c   :  { %v4168_v7 = vrot.slane %v4161_v1, %v7112_v16  ;;  %v4201_v45 = vrot.slane %v4194_v0, %v7112_v16 }
 0x45e   :  { %v4175_v38 = vrot.slane %v4168_v7, %v7112_v16  ;;  %v4180_v39 = vcombine.high %v4168_v7, %v4168_v7  ;;  %v4208_v48 = vrot.slane %v4201_v45, %v7112_v16  ;;  %v4213_v49 = vcombine.high %v4201_v45, %v4201_v45  ;;  %v3980_v56 = vpop.f32.mrb[32].mxu0  ;;  %v4021_v37 = vpop.f32.mrb[32].mxu1 }
 0x45f   :  { %v3981_v6 = vadd.f32 %v3980_v56, %v3507_v26  ;;  %v4022_v17 = vadd.f32 %v4021_v37, %v3515_v18  ;;  %v3982_v50 = vpop.f32.mrb[33].mxu0  ;;  %v4023_v8 = vpop.f32.mrb[33].mxu1 }
 0x460   :  { %4178 = vst.msk [vmem:[#allocation3 + $0x4] ss:$8 sm:$0x3] %vm7119_vm10, %v4175_v38  ;;  %v4187_v11 = vrot.slane %v4180_v39, %v7112_v16  ;;  %4211 = vst.msk [vmem:[#allocation3 + $0x5] ss:$8 sm:$0x3] %vm7119_vm10, %v4208_v48  ;;  %v4220_v14 = vrot.slane %v4213_v49, %v7112_v16  ;;  %v3983_v47 = vadd.f32 %v3982_v50, %v3511_v34 }
 0x461   :  { %v4024_v63 = vadd.f32 %v4023_v8, %v3519_v2  ;;  %v3984_v25 = vpop.f32.mrb[34].mxu0  ;;  %v4025_v12 = vpop.f32.mrb[34].mxu1 }
 0x462   :  { %v3985_v5 = vpop.f32.mrb[35].mxu0  ;;  %v4026_v10 = vpop.f32.mrb[35].mxu1  ;;  %4190 = vst.msk [vmem:[#allocation3 + $0x14] ss:$8 sm:$0x3] %vm7119_vm10, %v4187_v11  ;;  %v4227_v13 = vcombine.low %v3981_v6, %v3983_v47 }
 0x463   :  { %4223 = vst.msk [vmem:[#allocation3 + $0x15] ss:$8 sm:$0x3] %vm7119_vm10, %v4220_v14  ;;  %v4260_v41 = vcombine.low %v4022_v17, %v4024_v63 }
 0x464   :  { %v4234_v19 = vrot.slane %v4227_v13, %v7112_v16 }
 0x465   :  { %v4267_v4 = vrot.slane %v4260_v41, %v7112_v16  ;;  %v4311_v41 = vld [vmem:[%s7967_s9] sm:$0xf] }
 0x466   :  { %v4241_v20 = vrot.slane %v4234_v19, %v7112_v16  ;;  %v4246_v46 = vcombine.high %v4234_v19, %v4234_v19 }
 0x467   :  { %v4274_v1 = vrot.slane %v4267_v4, %v7112_v16  ;;  %v4279_v0 = vcombine.high %v4267_v4, %v4267_v4 }
 0x468   :  { %4244 = vst.msk [vmem:[#allocation3 + $0x6] ss:$8 sm:$0x3] %vm7119_vm10, %v4241_v20  ;;  %v4253_v26 = vrot.slane %v4246_v46, %v7112_v16 }
 0x469   :  { %4277 = vst.msk [vmem:[#allocation3 + $0x7] ss:$8 sm:$0x3] %vm7119_vm10, %v4274_v1  ;;  %v4286_v18 = vrot.slane %v4279_v0, %v7112_v16  ;;  %v5774_v16 = vld [vmem:[%s7966_s10] sm:$0xf] }
 0x46a   :  { %4256 = vst.msk [vmem:[#allocation3 + $0x16] ss:$8 sm:$0x3] %vm7119_vm10, %v4253_v26 }
 0x46b   :  { %4289 = vst.msk [vmem:[#allocation3 + $0x17] ss:$8 sm:$0x3] %vm7119_vm10, %v4286_v18 }
 0x470   :  { %v7706_v7 = vld [vmem:[#allocation3 + $0x8] sm:$0xff]  ;;  %v7708_v45 = vld [vmem:[#allocation3] sm:$0xff] }
 0x471   :  { %4314 = vrot.lane.b32.xlu0 %v7706_v7, %s6471_s25  ;;  %4312 = vrot.lane.b32.xlu1 %v7708_v45, %s6471_s25 }
 0x472   :  { %v7714_v34 = vld [vmem:[#allocation3 + $0x18] sm:$0xff]  ;;  %v7716_v2 = vld [vmem:[#allocation3 + $0x10] sm:$0xff] }
 0x475   :  { %4318 = vrot.lane.b32.xlu0 %v7714_v34, %s6471_s25  ;;  %4316 = vrot.lane.b32.xlu1 %v7716_v2, %s6471_s25 }
 0x479   :  { %4297 = vrot.lane.b32.xlu0 %v7706_v7, %s6472_s1  ;;  %4295 = vrot.lane.b32.xlu1 %v7708_v45, %s6472_s1 }
 0x47d   :  { %4301 = vrot.lane.b32.xlu0 %v7714_v34, %s6472_s1  ;;  %4299 = vrot.lane.b32.xlu1 %v7716_v2, %s6472_s1 }
 0x481   :  { %4623 = vrot.lane.b32.xlu0 %v7706_v7, %s6473_s26  ;;  %4621 = vrot.lane.b32.xlu1 %v7708_v45, %s6473_s26 }
 0x485   :  { %4627 = vrot.lane.b32.xlu0 %v7714_v34, %s6473_s26  ;;  %4625 = vrot.lane.b32.xlu1 %v7716_v2, %s6473_s26 }
 0x489   :  { %4790 = vrot.lane.b32.xlu0 %v7706_v7, %s6474_s27  ;;  %4788 = vrot.lane.b32.xlu1 %v7708_v45, %s6474_s27 }
 0x48d   :  { %4794 = vrot.lane.b32.xlu0 %v7714_v34, %s6474_s27  ;;  %4792 = vrot.lane.b32.xlu1 %v7716_v2, %s6474_s27 }
 0x491   :  { %5108 = vrot.lane.b32.xlu0 %v7706_v7, %s6475_s28  ;;  %5106 = vrot.lane.b32.xlu1 %v7708_v45, %s6475_s28 }
 0x495   :  { %5112 = vrot.lane.b32.xlu0 %v7714_v34, %s6475_s28  ;;  %5110 = vrot.lane.b32.xlu1 %v7716_v2, %s6475_s28 }
 0x499   :  { %5275 = vrot.lane.b32.xlu0 %v7706_v7, %s6476_s29  ;;  %5273 = vrot.lane.b32.xlu1 %v7708_v45, %s6476_s29 }
 0x49d   :  { %5279 = vrot.lane.b32.xlu0 %v7714_v34, %s6476_s29  ;;  %5277 = vrot.lane.b32.xlu1 %v7716_v2, %s6476_s29 }
 0x4a1   :  { %5442 = vrot.lane.b32.xlu0 %v7706_v7, %s6477_s30  ;;  %5440 = vrot.lane.b32.xlu1 %v7708_v45, %s6477_s30 }
 0x4a5   :  { %5446 = vrot.lane.b32.xlu0 %v7714_v34, %s6477_s30  ;;  %5444 = vrot.lane.b32.xlu1 %v7716_v2, %s6477_s30 }
 0x4a9   :  { %5609 = vrot.lane.b32.xlu0 %v7706_v7, %s6478_s13  ;;  %5607 = vrot.lane.b32.xlu1 %v7708_v45, %s6478_s13 }
 0x4ad   :  { %5613 = vrot.lane.b32.xlu0 %v7714_v34, %s6478_s13  ;;  %5611 = vrot.lane.b32.xlu1 %v7716_v2, %s6478_s13 }
 0x4b1   :  { %5777 = vperm.xlu1 %6321, %v5774_v16   ;;  %v6046_v16 = vld [vmem:[%s7967_s9 + $0x8] sm:$0xf] }
 0x4e3   :  { %v4315_v44 = vpop.permute.xlu0 %4314  ;;  %v4313_v38 = vpop.permute.xlu1 %4312 }
 0x4e4   :  { %v4322_v39 = vsel %vm101_vm0, %v4313_v38, %v4315_v44 }
 0x4e5   :  { %v4325_v48 = vmul.f32 %v4322_v39, %v6690_v23  ;;  %v6041_v23 = vld [vmem:[%s7967_s9 + $0x4] sm:$0xf] }
 0x4e7   :  { %v4319_v49 = vpop.permute.xlu0 %4318  ;;  %4334 = vmatprep.subr.mxu0 %v4325_v48  ;;  %v4317_v56 = vpop.permute.xlu1 %4316 }
 0x4e8   :  { %v4323_v37 = vsel %vm101_vm0, %v4319_v49, %v4313_v38  ;;  %v4320_v6 = vsel %vm101_vm0, %v4317_v56, %v4319_v49  ;;  %v4321_v17 = vsel %vm101_vm0, %v4315_v44, %v4317_v56 }
 0x4e9   :  { %v4324_v50 = vmul.f32 %v4323_v37, %v6682_v21  ;;  %v4326_v8 = vmul.f32 %v4321_v17, %v6686_v22  ;;  %v4327_v11 = vmul.f32 %v4320_v6, %v6694_v24  ;;  %v6049_v17 = vld [vmem:[%s7967_s9 + $0xc] sm:$0xf] }
 0x4eb   :  { %v4298_v14 = vpop.permute.xlu0 %4297  ;;  %4335 = vmatpush1.msra.mxu0 %v4324_v50  ;;  %4405 = vmatprep.subr.mxu1 %v4327_v11  ;;  %v4296_v47 = vpop.permute.xlu1 %4295 }
 0x4ec   :  { %v4305_v63 = vsel %vm67_vm2, %v4296_v47, %v4298_v14  ;;  %6042 = vmatmul.mubr.msk.f32.vlgmr.msra.gmra.mrb[2].mxu0 %vm4330_vm13, %v6041_v23  ;;  %4406 = vmatpush1.msra.mxu1 %v4326_v8 }
 0x4ed   :  { %v4308_v21 = vmul.f32 %v4305_v63, %v6698_v27  ;;  %6043 = vmatmul.mubr.msk.f32.vlgmr.msra.gmra.mrb[2].mxu1 %vm4330_vm13, %v6041_v23  ;;  %4543 = vmatprep.mubr.f32.mxu0 %v7973_v15  ;;  %v6052_v23 = vld [vmem:[%s7967_s9 + $0x10] sm:$0xf] }
 0x4ee   :  { %4614 = vmatprep.mubr.f32.mxu1 %v7973_v15 }
 0x4ef   :  { %v4302_v22 = vpop.permute.xlu0 %4301  ;;  %4479 = vmatprep.subr.mxu0 %v4308_v21  ;;  %v4300_v24 = vpop.permute.xlu1 %4299 }
 0x4f0   :  { %v4306_v25 = vsel %vm67_vm2, %v4302_v22, %v4296_v47  ;;  %v4303_v12 = vsel %vm67_vm2, %v4300_v24, %v4302_v22  ;;  %v4304_v5 = vsel %vm67_vm2, %v4298_v14, %v4300_v24 }
 0x4f1   :  { %v4307_v27 = vmul.f32 %v4306_v25, %v6724_v40  ;;  %v4309_v10 = vmul.f32 %v4304_v5, %v6731_v42  ;;  %v4310_v13 = vmul.f32 %v4303_v12, %v6735_v43  ;;  %v6055_v5 = vld [vmem:[%s7967_s9 + $0x14] sm:$0xf] }
 0x4f3   :  { %v4624_v19 = vpop.permute.xlu0 %4623  ;;  %4480 = vmatpush1.msra.mxu0 %v4307_v27  ;;  %4550 = vmatprep.subr.mxu1 %v4310_v13  ;;  %v4622_v4 = vpop.permute.xlu1 %4621 }
 0x4f4   :  { %v4631_v20 = vsel %vm452_vm4, %v4622_v4, %v4624_v19  ;;  %6044 = vmatmul.mubr.msk.f32.vlgmr.msra.gmra.mrb[2].mxu0 %vm4330_vm13, %v4311_v41  ;;  %4551 = vmatpush1.msra.mxu1 %v4309_v10 }
 0x4f5   :  { %v4634_v40 = vmul.f32 %v4631_v20, %v6754_v53  ;;  %6045 = vmatmul.mubr.msk.f32.vlgmr.msra.gmra.mrb[2].mxu1 %vm4330_vm13, %v4311_v41  ;;  %4706 = vmatprep.mubr.f32.mxu0 %v7973_v15 }
 0x4f6   :  { %4777 = vmatprep.mubr.f32.mxu1 %v7973_v15 }
 0x4f7   :  { %v4628_v42 = vpop.permute.xlu0 %4627  ;;  %4642 = vmatprep.subr.mxu0 %v4634_v40  ;;  %v4626_v43 = vpop.permute.xlu1 %4625 }
 0x4f8   :  { %v4632_v46 = vsel %vm452_vm4, %v4628_v42, %v4622_v4  ;;  %v4629_v1 = vsel %vm452_vm4, %v4626_v43, %v4628_v42  ;;  %v4630_v0 = vsel %vm452_vm4, %v4624_v19, %v4626_v43  ;;  %v6058_v42 = vld [vmem:[%s7967_s9 + $0x18] sm:$0xf] }
 0x4f9   :  { %v4633_v53 = vmul.f32 %v4632_v46, %v6764_v57  ;;  %v4635_v26 = vmul.f32 %v4630_v0, %v6771_v59  ;;  %v4636_v18 = vmul.f32 %v4629_v1, %v6775_v60 }
 0x4fb   :  { %v4791_v44 = vpop.permute.xlu0 %4790  ;;  %4643 = vmatpush1.msra.mxu0 %v4633_v53  ;;  %4713 = vmatprep.subr.mxu1 %v4636_v18  ;;  %v4789_v38 = vpop.permute.xlu1 %4788 }
 0x4fc   :  { %v4798_v39 = vsel %vm648_vm5, %v4789_v38, %v4791_v44  ;;  %6047 = vmatmul.mubr.msk.f32.vlgmr.msra.gmra.mrb[2].mxu0 %vm4330_vm13, %v6046_v16  ;;  %4714 = vmatpush1.msra.mxu1 %v4635_v26  ;;  %v6466_v26 = vld [vmem:[%s7959_s0 + $0x38] ss:$0 sm:$0xff] }
 0x4fd   :  { %v4801_v57 = vmul.f32 %v4798_v39, %v6794_v29  ;;  %6048 = vmatmul.mubr.msk.f32.vlgmr.msra.gmra.mrb[2].mxu1 %vm4330_vm13, %v6046_v16  ;;  %4873 = vmatprep.mubr.f32.mxu0 %v7973_v15  ;;  %v6061_v39 = vld [vmem:[%s7967_s9 + $0x1c] sm:$0xf] }
 0x4fe   :  { %4944 = vmatprep.mubr.f32.mxu1 %v7973_v15 }
 0x4ff   :  { %v4795_v59 = vpop.permute.xlu0 %4794  ;;  %4809 = vmatprep.subr.mxu0 %v4801_v57  ;;  %v4793_v60 = vpop.permute.xlu1 %4792  ;;  %v6468_v57 = vld [vmem:[%s7959_s0 + $0x20] ss:$0 sm:$0xff] }
 0x500   :  { %v4799_v48 = vsel %vm648_vm5, %v4795_v59, %v4789_v38  ;;  %v4796_v49 = vsel %vm648_vm5, %v4793_v60, %v4795_v59  ;;  %v4797_v56 = vsel %vm648_vm5, %v4791_v44, %v4793_v60  ;;  %v6467_v44 = vld [vmem:[%s7959_s0 + $0x28] ss:$0 sm:$0xff] }
 0x501   :  { %v4800_v29 = vmul.f32 %v4799_v48, %v6803_v33  ;;  %v4802_v37 = vmul.f32 %v4797_v56, %v6811_v35  ;;  %v4803_v6 = vmul.f32 %v4796_v49, %v6815_v36  ;;  %v6064_v48 = vld [vmem:[%s7967_s9 + $0x20] sm:$0xf] }
 0x503   :  { %v5109_v50 = vpop.permute.xlu0 %5108  ;;  %4810 = vmatpush1.msra.mxu0 %v4800_v29  ;;  %4880 = vmatprep.subr.mxu1 %v4803_v6  ;;  %v5107_v8 = vpop.permute.xlu1 %5106 }
 0x504   :  { %6050 = vmatmul.mubr.msk.f32.vlgmr.msra.gmra.mrb[2].mxu0 %vm4330_vm13, %v6049_v17  ;;  %4881 = vmatpush1.msra.mxu1 %v4802_v37  ;;  %v5116_v36 = vsel %vm1003_vm6, %v5107_v8, %v5109_v50 }
 0x505   :  { %4960 = vmatprep.subr.mxu0 %v7706_v7  ;;  %6051 = vmatmul.mubr.msk.f32.vlgmr.msra.gmra.mrb[2].mxu1 %vm4330_vm13, %v6049_v17  ;;  %v5118_v14 = vmul.f32 %v5116_v36, %v6849_v54 }
 0x506   :  { %4961 = vmatpush1.msra.mxu0 %v7708_v45  ;;  %5031 = vmatprep.subr.mxu1 %v7714_v34 }
 0x507   :  { %5032 = vmatpush1.msra.mxu1 %v7716_v2  ;;  %v5113_v33 = vpop.permute.xlu0 %5112  ;;  %v5111_v35 = vpop.permute.xlu1 %5110  ;;  %5024 = vmatprep.mubr.f32.mxu0 %v7973_v15 }
 0x508   :  { %v5117_v11 = vsel %vm1003_vm6, %v5113_v33, %v5107_v8  ;;  %v5115_v7 = vsel %vm1003_vm6, %v5109_v50, %v5111_v35  ;;  %5095 = vmatprep.mubr.f32.mxu1 %v7973_v15  ;;  %v5114_v34 = vsel %vm1003_vm6, %v5111_v35, %v5113_v33 }
 0x509   :  { %v5121_v45 = vmul.f32 %v5117_v11, %v6845_v52  ;;  %v5119_v2 = vmul.f32 %v5115_v7, %v6841_v51  ;;  %v5120_v21 = vmul.f32 %v5114_v34, %v6853_v55 }
 0x50b   :  { %v5276_v47 = vpop.permute.xlu0 %5275  ;;  %5127 = vmatprep.subr.mxu0 %v5119_v2  ;;  %5198 = vmatprep.subr.mxu1 %v5121_v45  ;;  %v5274_v63 = vpop.permute.xlu1 %5273 }
 0x50c   :  { %6053 = vmatmul.mubr.msk.f32.vlgmr.msra.gmra.mrb[2].mxu0 %vm4330_vm13, %v6052_v23  ;;  %v5283_v54 = vsel %vm1199_vm7, %v5274_v63, %v5276_v47 }
 0x50d   :  { %5128 = vmatpush1.msra.mxu0 %v5118_v14  ;;  %6054 = vmatmul.mubr.msk.f32.vlgmr.msra.gmra.mrb[2].mxu1 %vm4330_vm13, %v6052_v23  ;;  %v5285_v27 = vmul.f32 %v5283_v54, %v6896_v31 }
 0x50e   :  { %5199 = vmatpush1.msra.mxu1 %v5120_v21  ;;  %5191 = vmatprep.mubr.f32.mxu0 %v7973_v15 }
 0x50f   :  { %v5280_v51 = vpop.permute.xlu0 %5279  ;;  %v5278_v52 = vpop.permute.xlu1 %5277  ;;  %5262 = vmatprep.mubr.f32.mxu1 %v7973_v15 }
 0x510   :  { %v5284_v22 = vsel %vm1199_vm7, %v5280_v51, %v5274_v63  ;;  %v5282_v55 = vsel %vm1199_vm7, %v5276_v47, %v5278_v52  ;;  %v5281_v25 = vsel %vm1199_vm7, %v5278_v52, %v5280_v51 }
 0x511   :  { %v5288_v24 = vmul.f32 %v5284_v22, %v6892_v30  ;;  %v5286_v12 = vmul.f32 %v5282_v55, %v6888_v28  ;;  %v5287_v41 = vmul.f32 %v5281_v25, %v6901_v32 }
 0x513   :  { %v5443_v10 = vpop.permute.xlu0 %5442  ;;  %5294 = vmatprep.subr.mxu0 %v5286_v12  ;;  %5365 = vmatprep.subr.mxu1 %v5288_v24  ;;  %v5441_v13 = vpop.permute.xlu1 %5440 }
 0x514   :  { %6056 = vmatmul.mubr.msk.f32.vlgmr.msra.gmra.mrb[2].mxu0 %vm4330_vm13, %v6055_v5  ;;  %v5450_v31 = vsel %vm1395_vm8, %v5441_v13, %v5443_v10 }
 0x515   :  { %5295 = vmatpush1.msra.mxu0 %v5285_v27  ;;  %6057 = vmatmul.mubr.msk.f32.vlgmr.msra.gmra.mrb[2].mxu1 %vm4330_vm13, %v6055_v5  ;;  %v5452_v43 = vmul.f32 %v5450_v31, %v6939_v62 }
 0x516   :  { %5366 = vmatpush1.msra.mxu1 %v5287_v41  ;;  %5358 = vmatprep.mubr.f32.mxu0 %v7973_v15 }
 0x517   :  { %v5447_v28 = vpop.permute.xlu0 %5446  ;;  %v5445_v30 = vpop.permute.xlu1 %5444  ;;  %5429 = vmatprep.mubr.f32.mxu1 %v7973_v15 }
 0x518   :  { %v5451_v19 = vsel %vm1395_vm8, %v5447_v28, %v5441_v13  ;;  %v5449_v32 = vsel %vm1395_vm8, %v5443_v10, %v5445_v30  ;;  %v5448_v20 = vsel %vm1395_vm8, %v5445_v30, %v5447_v28 }
 0x519   :  { %v5455_v4 = vmul.f32 %v5451_v19, %v6935_v61  ;;  %v5453_v40 = vmul.f32 %v5449_v32, %v6931_v58  ;;  %v5454_v0 = vmul.f32 %v5448_v20, %v6944_v3 }
 0x51b   :  { %v5610_v46 = vpop.permute.xlu0 %5609  ;;  %5461 = vmatprep.subr.mxu0 %v5453_v40  ;;  %5532 = vmatprep.subr.mxu1 %v5455_v4  ;;  %v5608_v1 = vpop.permute.xlu1 %5607 }
 0x51c   :  { %6059 = vmatmul.mubr.msk.f32.vlgmr.msra.gmra.mrb[2].mxu0 %vm4330_vm13, %v6058_v42  ;;  %v5617_v62 = vsel %vm1591_vm9, %v5608_v1, %v5610_v46 }
 0x51d   :  { %5462 = vmatpush1.msra.mxu0 %v5452_v43  ;;  %6060 = vmatmul.mubr.msk.f32.vlgmr.msra.gmra.mrb[2].mxu1 %vm4330_vm13, %v6058_v42  ;;  %v5619_v59 = vmul.f32 %v6468_v57, %v5617_v62 }
 0x51e   :  { %5533 = vmatpush1.msra.mxu1 %v5454_v0  ;;  %5525 = vmatprep.mubr.f32.mxu0 %v7973_v15 }
 0x51f   :  { %v5614_v58 = vpop.permute.xlu0 %5613  ;;  %v5612_v61 = vpop.permute.xlu1 %5611  ;;  %5596 = vmatprep.mubr.f32.mxu1 %v7973_v15 }
 0x520   :  { %v5618_v53 = vsel %vm1591_vm9, %v5614_v58, %v5608_v1  ;;  %v5616_v3 = vsel %vm1591_vm9, %v5610_v46, %v5612_v61  ;;  %v5615_v16 = vsel %vm1591_vm9, %v5612_v61, %v5614_v58 }
 0x521   :  { %v5622_v18 = vmul.f32 %v6466_v26, %v5618_v53  ;;  %v5620_v38 = vmul.f32 %v6467_v44, %v5616_v3  ;;  %v5621_v60 = vmul.f32 %v6469_v9, %v5615_v16 }
 0x523   :  { %5628 = vmatprep.subr.mxu0 %v5620_v38  ;;  %5699 = vmatprep.subr.mxu1 %v5622_v18 }
 0x524   :  { %6062 = vmatmul.mubr.msk.f32.vlgmr.msra.gmra.mrb[2].mxu0 %vm4330_vm13, %v6061_v39 }
 0x525   :  { %5629 = vmatpush1.msra.mxu0 %v5619_v59  ;;  %6063 = vmatmul.mubr.msk.f32.vlgmr.msra.gmra.mrb[2].mxu1 %vm4330_vm13, %v6061_v39 }
 0x526   :  { %5700 = vmatpush1.msra.mxu1 %v5621_v60  ;;  %5692 = vmatprep.mubr.f32.mxu0 %v7973_v15 }
 0x527   :  { %5763 = vmatprep.mubr.f32.mxu1 %v7973_v15 }
 0x52c   :  { %6065 = vmatmul.mubr.msk.f32.vlgmr.msra.gmra.mrb[2].mxu0 %vm4330_vm13, %v6064_v48 }
 0x52d   :  { %6066 = vmatmul.mubr.msk.f32.vlgmr.msra.gmra.mrb[2].mxu1 %vm4330_vm13, %v6064_v48 }
 0x530   :  { %v5778_v49 = vpop.permute.xlu1 %5777 }
 0x5ff   :  { %v5694_v56 = vpop.f32.mrb[2].mxu0 }
 0x600   :  { %v5780_v29 = vadd.f32 %v5778_v49, %v5694_v56  ;;  %v5696_v37 = vpop.f32.mrb[3].mxu0  ;;  %v5765_v6 = vpop.f32.mrb[2].mxu1 }
 0x601   :  { %v5781_v17 = vadd.f32 %v5778_v49, %v5696_v37  ;;  %v5782_v50 = vadd.f32 %v5778_v49, %v5765_v6  ;;  %v5767_v8 = vpop.f32.mrb[3].mxu1 }
 0x602   :  { %6458 = vtanh.f32 %v5780_v29  ;;  %v5783_v33 = vadd.f32 %v5778_v49, %v5767_v8 }
 0x603   :  { %6460 = vtanh.f32 %v5781_v17 }
 0x604   :  { %6462 = vtanh.f32 %v5782_v50 }
 0x605   :  { %6464 = vtanh.f32 %v5783_v33 }
 0x60c   :  { %v6459_v15 = vpop.eup %6458 }
 0x60d   :  { %v6461_v35 = vpop.eup %6460 }
 0x60e   :  { %v6463_v36 = vpop.eup %6462  ;;  %v5792_v11 = vcombine.low %v6459_v15, %v6461_v35 }
 0x60f   :  { %v6465_v7 = vpop.eup %6464 }
 0x610   :  { %5796 = vst [vmem:[%s7968_s11] sm:$0xff] %v5792_v11  ;;  %v5793_v45 = vcombine.low %v6463_v36, %v6465_v7 }
 0x612   :  { %5797 = vst [vmem:[%s7968_s11 + $0x8] sm:$0xff] %v5793_v45 }

</bundles_post_ra>
